<compile_context>
chip_gen: v6e
topology: v6e:2x2x1
jax: 0.10.0
libtpu: 0.0.40
codegen_flags: <defaults>
</compile_context>

<pallas_src>
import jax
import jax.numpy as jnp
from jax import lax
from jax.experimental import pallas as pl
from jax.experimental.pallas import tpu as pltpu

C_MID = 32    # hidden channels of the per-depth conv stack (fixed by the module)
C_IN = 3      # x, y, z single-channel input planes
C_IN_PAD = 4  # padded to 4 so each im2col tap block is sublane-friendly


def _round_up(n, m):
    return ((n + m - 1) // m) * m


def pack_weights(w1_struct, w2_struct):
    """Block-diagonal weight packing.  Call ONCE, outside the per-call path.

    w1_struct : (depth, 3, 3, 3, C_MID)  [d, ky, kx, cin, cout]  conv1 (no bias)
    w2_struct : (depth, 3, 3, C_MID)     [d, ky, kx, cin]        conv2 (cout=1, no bias)
    returns   : w1_bd (depth*C_MID, 9*C_IN_PAD*depth),
                w2_bd (9*d_pad, depth*C_MID)   with d_pad = round_up(depth, 8)
    """
    f32 = jnp.float32
    depth = w1_struct.shape[0]
    d_pad = _round_up(depth, 8)
    CH = C_MID * depth
    eye_d = jnp.eye(depth, dtype=f32)

    # conv1 -> block-diagonal: row = d*32 + cout ; col = tap*(4*depth) + d2*4 + cin.
    w1_r = jnp.transpose(w1_struct.astype(f32), (0, 4, 1, 2, 3)).reshape(depth, C_MID, 9, C_IN)
    w1_bd = jnp.einsum("acti,ae->actei", w1_r, eye_d)          # (d, cout, tap, d2, cin)
    w1_bd = jnp.pad(w1_bd, ((0, 0),) * 4 + ((0, C_IN_PAD - C_IN),))
    w1_bd = w1_bd.reshape(CH, 9 * C_IN_PAD * depth)

    # conv2 -> block-diagonal with 8-sublane-aligned tap blocks:
    #   row = tap*d_pad + d ; col = d2*32 + ch ; rows d >= depth are zero.
    w2_r = w2_struct.astype(f32).reshape(depth, 9, C_MID)
    w2_bd = jnp.einsum("atc,ae->taec", w2_r, eye_d).reshape(9, depth, CH)
    w2_bd = jnp.pad(w2_bd, ((0, 0), (0, d_pad - depth), (0, 0))).reshape(9 * d_pad, CH)
    return w1_bd, w2_bd


def share_module_more_forward(x, y, z, w1_bd, w2_bd):
    """AFM forward.

    x, y, z : (B, depth, H, W) f32
    w1_bd   : packed conv1 weights from pack_weights()
    w2_bd   : packed conv2 weights from pack_weights()
    returns : (B, depth, H, W) f32
    """
    B, depth, H, W = x.shape
    assert y.shape == x.shape and z.shape == x.shape
    f32 = jnp.float32

    Hp, Wp = H + 2, W + 2
    Np = Hp * Wp                         # flattened padded plane
    Np_pad = _round_up(Np, 128)          # lane axis padded to a multiple of 128
    NL = B * Np_pad                      # batch folded onto the lane axis
    CH = C_MID * depth
    KP = 9 * C_IN_PAD * depth
    d_pad = _round_up(depth, 8)          # conv2 tap-block rows (sublane aligned)
    assert w1_bd.shape == (CH, KP), w1_bd.shape
    assert w2_bd.shape == (9 * d_pad, CH), w2_bd.shape
    # NOTE: sublane alignment assumes depth*C_IN_PAD and C_MID*depth are
    # multiples of 8 (true for the module's typical depth=4).

    # ------------- wrapper-side input packing (cheap pads / stacks only) -------------
    def pad_plane(a):
        a = jnp.pad(a.astype(f32), ((0, 0), (0, 0), (1, 1), (1, 1)))   # (B, d, Hp, Wp)
        a = a.reshape(B, depth, Np)
        return jnp.pad(a, ((0, 0), (0, 0), (0, Np_pad - Np)))          # (B, d, Np_pad)

    planes = jnp.stack([pad_plane(x), pad_plane(y), pad_plane(z)], axis=2)     # (B, d, 3, Np_pad)
    planes = jnp.pad(planes, ((0, 0), (0, 0), (0, C_IN_PAD - C_IN), (0, 0)))   # (B, d, 4, Np_pad)
    in_all = jnp.transpose(planes, (1, 2, 0, 3)).reshape(depth * C_IN_PAD, NL)  # row=d*4+ci

    # Interior mask: 1 on real pixels, 0 on halo + lane padding (re-zeroes conv1's
    # halo output so conv2 sees proper zero padding).
    mask = jnp.pad(jnp.ones((H, W), f32), ((1, 1), (1, 1))).reshape(Np)
    mask = jnp.pad(mask, (0, Np_pad - Np))
    interior = jnp.tile(mask, (B,)).reshape(1, NL)

    # Flattened-lane offsets of the nine 3x3 taps on the padded plane.
    shifts = [(dy - 1) * Wp + (dx - 1) for dy in range(3) for dx in range(3)]

    def roll_left(a, s):
        # result[..., m] = a[..., (m + s) % NL]  ==  jnp.roll(a, -s); XLU lane rotate.
        r = s % NL
        if r == 0:
            return a
        return pltpu.roll(a, NL - r, 1)

    # ---------------------------------- kernel ----------------------------------
    def afm_kernel(in_ref, w1_ref, w2_ref, mask_ref, o_ref):
        x_all = in_ref[...]               # (4*depth, NL)  packed padded planes
        w1 = w1_ref[...]                  # (CH, KP)
        w2 = w2_ref[...]                  # (9*d_pad, CH)
        inside = mask_ref[...]            # (1, NL)

        # im2col: the 9 taps are static lane rolls of the flattened padded planes.
        patches = jnp.concatenate([roll_left(x_all, s) for s in shifts], axis=0)   # (KP, NL)

        # Conv1 (3->32 for every depth at once) on the MXU, ReLU, re-zero the halo.
        hid = jnp.dot(w1, patches, preferred_element_type=jnp.float32)             # (CH, NL)
        hid = jnp.maximum(hid, 0.0) * inside

        # Conv2 channel contraction (32->1 per depth, per tap) on the MXU.
        g = jnp.dot(w2, hid, preferred_element_type=jnp.float32)                   # (9*d_pad, NL)

        # Sum the 9 lane-rolled tap planes (8-sublane aligned blocks) + final ReLU.
        acc = jnp.zeros((d_pad, NL), jnp.float32)
        for t, s in enumerate(shifts):
            acc = acc + roll_left(g[t * d_pad:(t + 1) * d_pad, :], s)
        o_ref[...] = jnp.maximum(acc, 0.0)          # fully lane-dense, sublane-aligned store

    out_p = pl.pallas_call(
        afm_kernel,
        out_shape=jax.ShapeDtypeStruct((d_pad, NL), f32),
    )(in_all, w1_bd, w2_bd, interior)

    # Strip padded depth rows, lane padding and the spatial halo; restore (B, depth, H, W).
    out = out_p[:depth].reshape(depth, B, Np_pad)[:, :, :Np]
    out = out.reshape(depth, B, Hp, Wp)[:, :, 1:H + 1, 1:W + 1]
    return jnp.transpose(out, (1, 0, 2, 3))


def reference(x, y, z, w1_struct, w2_struct):
    """Pure-JAX reference using lax.conv (NCHW, OIHW), matching the PyTorch module."""
    B, depth, H, W = x.shape
    outs = []
    for i in range(depth):
        inp = jnp.stack([x[:, i], y[:, i], z[:, i]], axis=1)               # (B, 3, H, W)
        k1 = jnp.transpose(w1_struct[i], (3, 2, 0, 1))                     # (32, 3, 3, 3)
        h = lax.conv_general_dilated(inp, k1, (1, 1), ((1, 1), (1, 1)),
                                     dimension_numbers=("NCHW", "OIHW", "NCHW"))
        h = jnp.maximum(h, 0.0)
        k2 = jnp.transpose(w2_struct[i][:, :, :, None], (3, 2, 0, 1))      # (1, 32, 3, 3)
        o = lax.conv_general_dilated(h, k2, (1, 1), ((1, 1), (1, 1)),
                                     dimension_numbers=("NCHW", "OIHW", "NCHW"))
        outs.append(jnp.maximum(o, 0.0))
    return jnp.concatenate(outs, axis=1)


if __name__ == "__main__":
    B, DEPTH, H, W = 2, 4, 16, 16

    key = jax.random.PRNGKey(0)
    k_x, k_y, k_z, k_w1, k_w2 = jax.random.split(key, 5)

    x = jax.random.normal(k_x, (B, DEPTH, H, W), jnp.float32)
    y = jax.random.normal(k_y, (B, DEPTH, H, W), jnp.float32)
    z = jax.random.normal(k_z, (B, DEPTH, H, W), jnp.float32)

    # Deterministic synthetic weights shaped per the module's __init__:
    #   conv1: (32, 3, 3, 3) per depth, conv2: (1, 32, 3, 3) per depth (no bias).
    # Stored here as (depth, ky, kx, cin, cout) / (depth, ky, kx, cin).
    w1_struct = jax.random.normal(k_w1, (DEPTH, 3, 3, 3, C_MID), jnp.float32) * 0.2
    w2_struct = jax.random.normal(k_w2, (DEPTH, 3, 3, C_MID), jnp.float32) * 0.2

    # Weight packing happens once, outside the per-call path.
    w1_bd, w2_bd = pack_weights(w1_struct, w2_struct)

    fwd = jax.jit(share_module_more_forward)
    out = jax.block_until_ready(fwd(x, y, z, w1_bd, w2_bd))

    assert out.shape == (B, DEPTH, H, W), out.shape
    ref = reference(x, y, z, w1_struct, w2_struct)
    err = float(jnp.max(jnp.abs(out - ref)))
    assert jnp.allclose(out, ref, atol=1e-4, rtol=1e-4), f"max abs err = {err}"

    print("KERNEL_OK")
</pallas_src>

<mosaic_0001>
module attributes {stable_mosaic.version = 11 : i64} {
  func.func @afm_kernel(%arg0: memref<16x768xf32, #tpu.memory_space<vmem>>, %arg1: memref<128x144xf32, #tpu.memory_space<vmem>>, %arg2: memref<72x128xf32, #tpu.memory_space<vmem>>, %arg3: memref<1x768xf32, #tpu.memory_space<vmem>>, %arg4: memref<8x768xf32, #tpu.memory_space<vmem>>) attributes {dimension_semantics = [], scalar_prefetch = 0 : i64, scratch_operands = 0 : i64, tpu.core_type = #tpu.core_type<tc>} {
    %c0 = arith.constant 0 : index
    %c0_0 = arith.constant 0 : index
    %0 = vector.load %arg0[%c0, %c0_0] : memref<16x768xf32, #tpu.memory_space<vmem>>, vector<16x768xf32>
    %c0_1 = arith.constant 0 : index
    %c0_2 = arith.constant 0 : index
    %1 = vector.load %arg1[%c0_1, %c0_2] : memref<128x144xf32, #tpu.memory_space<vmem>>, vector<128x144xf32>
    %c0_3 = arith.constant 0 : index
    %c0_4 = arith.constant 0 : index
    %2 = vector.load %arg2[%c0_3, %c0_4] : memref<72x128xf32, #tpu.memory_space<vmem>>, vector<72x128xf32>
    %c0_5 = arith.constant 0 : index
    %c0_6 = arith.constant 0 : index
    %3 = vector.load %arg3[%c0_5, %c0_6] : memref<1x768xf32, #tpu.memory_space<vmem>>, vector<1x768xf32>
    %c19_i32 = arith.constant 19 : i32
    %4 = tpu.dynamic_rotate %0 by %c19_i32 dim 1 : vector<16x768xf32>, i32 -> vector<16x768xf32>
    %c18_i32 = arith.constant 18 : i32
    %5 = tpu.dynamic_rotate %0 by %c18_i32 dim 1 : vector<16x768xf32>, i32 -> vector<16x768xf32>
    %c17_i32 = arith.constant 17 : i32
    %6 = tpu.dynamic_rotate %0 by %c17_i32 dim 1 : vector<16x768xf32>, i32 -> vector<16x768xf32>
    %c1_i32 = arith.constant 1 : i32
    %7 = tpu.dynamic_rotate %0 by %c1_i32 dim 1 : vector<16x768xf32>, i32 -> vector<16x768xf32>
    %c767_i32 = arith.constant 767 : i32
    %8 = tpu.dynamic_rotate %0 by %c767_i32 dim 1 : vector<16x768xf32>, i32 -> vector<16x768xf32>
    %c751_i32 = arith.constant 751 : i32
    %9 = tpu.dynamic_rotate %0 by %c751_i32 dim 1 : vector<16x768xf32>, i32 -> vector<16x768xf32>
    %c750_i32 = arith.constant 750 : i32
    %10 = tpu.dynamic_rotate %0 by %c750_i32 dim 1 : vector<16x768xf32>, i32 -> vector<16x768xf32>
    %c749_i32 = arith.constant 749 : i32
    %11 = tpu.dynamic_rotate %0 by %c749_i32 dim 1 : vector<16x768xf32>, i32 -> vector<16x768xf32>
    %12 = tpu.concatenate %4, %5, %6, %7, %0, %8, %9, %10, %11 in 0 : vector<16x768xf32>, vector<16x768xf32>, vector<16x768xf32>, vector<16x768xf32>, vector<16x768xf32>, vector<16x768xf32>, vector<16x768xf32>, vector<16x768xf32>, vector<16x768xf32> -> vector<144x768xf32>
    %cst = arith.constant dense<0.000000e+00> : vector<128x768xf32>
    %13 = tpu.matmul %1, %12, %cst {dimension_numbers = #tpu.dot_dimension_numbers<[1], [0], [0], [1], [0, 0, 1, 1], [], []>} : vector<128x144xf32>, vector<144x768xf32>, vector<128x768xf32> -> vector<128x768xf32>
    %cst_7 = arith.constant 0.000000e+00 : f32
    %14 = vector.broadcast %cst_7 : f32 to vector<128x768xf32>
    %15 = arith.maximumf %13, %14 : vector<128x768xf32>
    %16 = vector.broadcast %3 : vector<1x768xf32> to vector<128x768xf32>
    %17 = arith.mulf %15, %16 : vector<128x768xf32>
    %cst_8 = arith.constant dense<0.000000e+00> : vector<72x768xf32>
    %18 = tpu.matmul %2, %17, %cst_8 {dimension_numbers = #tpu.dot_dimension_numbers<[1], [0], [0], [1], [0, 0, 1, 1], [], []>} : vector<72x128xf32>, vector<128x768xf32>, vector<72x768xf32> -> vector<72x768xf32>
    %cst_9 = arith.constant 0.000000e+00 : f32
    %19 = vector.broadcast %cst_9 : f32 to vector<8x768xf32>
    %20 = vector.extract_strided_slice %18 {offsets = [0, 0], sizes = [8, 768], strides = [1, 1]} : vector<72x768xf32> to vector<8x768xf32>
    %c19_i32_10 = arith.constant 19 : i32
    %21 = tpu.dynamic_rotate %20 by %c19_i32_10 dim 1 : vector<8x768xf32>, i32 -> vector<8x768xf32>
    %22 = arith.addf %19, %21 : vector<8x768xf32>
    %23 = vector.extract_strided_slice %18 {offsets = [8, 0], sizes = [8, 768], strides = [1, 1]} : vector<72x768xf32> to vector<8x768xf32>
    %c18_i32_11 = arith.constant 18 : i32
    %24 = tpu.dynamic_rotate %23 by %c18_i32_11 dim 1 : vector<8x768xf32>, i32 -> vector<8x768xf32>
    %25 = arith.addf %22, %24 : vector<8x768xf32>
    %26 = vector.extract_strided_slice %18 {offsets = [16, 0], sizes = [8, 768], strides = [1, 1]} : vector<72x768xf32> to vector<8x768xf32>
    %c17_i32_12 = arith.constant 17 : i32
    %27 = tpu.dynamic_rotate %26 by %c17_i32_12 dim 1 : vector<8x768xf32>, i32 -> vector<8x768xf32>
    %28 = arith.addf %25, %27 : vector<8x768xf32>
    %29 = vector.extract_strided_slice %18 {offsets = [24, 0], sizes = [8, 768], strides = [1, 1]} : vector<72x768xf32> to vector<8x768xf32>
    %c1_i32_13 = arith.constant 1 : i32
    %30 = tpu.dynamic_rotate %29 by %c1_i32_13 dim 1 : vector<8x768xf32>, i32 -> vector<8x768xf32>
    %31 = arith.addf %28, %30 : vector<8x768xf32>
    %32 = vector.extract_strided_slice %18 {offsets = [32, 0], sizes = [8, 768], strides = [1, 1]} : vector<72x768xf32> to vector<8x768xf32>
    %33 = arith.addf %31, %32 : vector<8x768xf32>
    %34 = vector.extract_strided_slice %18 {offsets = [40, 0], sizes = [8, 768], strides = [1, 1]} : vector<72x768xf32> to vector<8x768xf32>
    %c767_i32_14 = arith.constant 767 : i32
    %35 = tpu.dynamic_rotate %34 by %c767_i32_14 dim 1 : vector<8x768xf32>, i32 -> vector<8x768xf32>
    %36 = arith.addf %33, %35 : vector<8x768xf32>
    %37 = vector.extract_strided_slice %18 {offsets = [48, 0], sizes = [8, 768], strides = [1, 1]} : vector<72x768xf32> to vector<8x768xf32>
    %c751_i32_15 = arith.constant 751 : i32
    %38 = tpu.dynamic_rotate %37 by %c751_i32_15 dim 1 : vector<8x768xf32>, i32 -> vector<8x768xf32>
    %39 = arith.addf %36, %38 : vector<8x768xf32>
    %40 = vector.extract_strided_slice %18 {offsets = [56, 0], sizes = [8, 768], strides = [1, 1]} : vector<72x768xf32> to vector<8x768xf32>
    %c750_i32_16 = arith.constant 750 : i32
    %41 = tpu.dynamic_rotate %40 by %c750_i32_16 dim 1 : vector<8x768xf32>, i32 -> vector<8x768xf32>
    %42 = arith.addf %39, %41 : vector<8x768xf32>
    %43 = vector.extract_strided_slice %18 {offsets = [64, 0], sizes = [8, 768], strides = [1, 1]} : vector<72x768xf32> to vector<8x768xf32>
    %c749_i32_17 = arith.constant 749 : i32
    %44 = tpu.dynamic_rotate %43 by %c749_i32_17 dim 1 : vector<8x768xf32>, i32 -> vector<8x768xf32>
    %45 = arith.addf %42, %44 : vector<8x768xf32>
    %cst_18 = arith.constant 0.000000e+00 : f32
    %46 = vector.broadcast %cst_18 : f32 to vector<8x768xf32>
    %47 = arith.maximumf %45, %46 : vector<8x768xf32>
    %c0_19 = arith.constant 0 : index
    %c0_20 = arith.constant 0 : index
    %48 = vector.load %arg4[%c0_19, %c0_20] : memref<8x768xf32, #tpu.memory_space<vmem>>, vector<8x768xf32>
    tpu.vector_store %arg4[%c0_19, %c0_20], %47 {strides = array<i32>} : memref<8x768xf32, #tpu.memory_space<vmem>>, vector<8x768xf32>,
    return
  }
}

</mosaic_0001>

<bundles_post_ra>
// kernel: share_module_more_forward.1
= control target key start
LH: loop header
LB: loop body
LE: loop exit
PB: predicated region body
PF: predicated region fallthrough
CT: control target
= control target key end

     0   :  { %s1784_s19 = smov 110   ;;  %s1785_s28 = smov 111   ;;  %vm369_vm0 = vcmask 130048   ;;  %v3555_v13 = vlaneseq  ;;  %s3550_s0 = inlined_call_operand.vmem [shape: f32[16,768], index: 0, kind: input, shape index: {}]   ;;  %s3551_s1 = inlined_call_operand.vmem [shape: f32[128,144], index: 1, kind: input, shape index: {}]   ;;  %s3552_s3 = inlined_call_operand.vmem [shape: f32[1,768], index: 3, kind: input, shape index: {}]   ;;  %s3553_s2 = inlined_call_operand.vmem [shape: f32[72,128], index: 2, kind: input, shape index: {}]   ;;  %s3554_s4 = inlined_call_operand.vmem [shape: f32[8,768], index: 4, kind: output, shape index: {}]  }
   0x1   :  { %v1821_v0 = vld [vmem:[%s3550_s0 + $0x38] sm:$0xff]  ;;  %v1826_v1 = vld [vmem:[%s3550_s0 + $0x30] sm:$0xff]  ;;  %v1835_v2 = vld [vmem:[%s3550_s0 + $0x40] sm:$0xff]  ;;  %s1786_s29 = smov 127   ;;  %s1787_s30 = smov 1  }
   0x2   :  { %301 = vrot.lane.b32.xlu0 %v1821_v0, %s1784_s19  ;;  %297 = vrot.lane.b32.xlu1 %v1826_v1, %s1784_s19  ;;  %v1840_v3 = vld [vmem:[%s3550_s0 + $0x8] sm:$0xff]  ;;  %v1849_v4 = vld [vmem:[%s3550_s0 + $0x10] sm:$0xff]  ;;  %s1788_s9 = smov 17   ;;  %s1789_s10 = smov 18   ;;  %v2004_v14 = vand.u32 127, %v3555_v13 }
   0x3   :  { %v1854_v5 = vld [vmem:[%s3550_s0] sm:$0xff]  ;;  %v1891_v6 = vld [vmem:[%s3550_s0 + $0x58] sm:$0xff]  ;;  %v1900_v7 = vld [vmem:[%s3550_s0 + $0x28] sm:$0xff]  ;;  %s1790_s11 = smov 19   ;;  %s1791_s14 = smov 109  }
   0x4   :  { %v1945_v8 = vld [vmem:[%s3551_s1 + $0x8] sm:$0xff]  ;;  %v1971_v10 = vld [vmem:[%s3550_s0 + $0x50] sm:$0xff]  ;;  %v1980_v11 = vld [vmem:[%s3550_s0 + $0x18] sm:$0xff]  ;;  %3582 = vst [vmem:[#allocation2_spill] sm:$0xff] %v2004_v14  ;;  %vm319_vm1 = vcmp.lt.s32.totalorder %v2004_v14, 110  ;;  %vm282_vm2 = vcmp.lt.s32.totalorder %v2004_v14, 111 }
   0x5   :  { %1695 = vmatprep.mubr.msk.f32.mxu0 %vm369_vm0, %v1945_v8  ;;  %1711 = vmatprep.mubr.msk.f32.mxu1 %vm369_vm0, %v1945_v8  ;;  %v1966_v9 = vld [vmem:[%s3550_s0 + $0x48] sm:$0xff]  ;;  %v1985_v12 = vld [vmem:[%s3550_s0 + $0x20] sm:$0xff]  ;;  %vm245_vm3 = vcmp.lt.s32.totalorder %v2004_v14, 127  ;;  %vm208_vm4 = vcmp.lt.s32.totalorder %v2004_v14, 1  ;;  %vm171_vm5 = vcmp.lt.s32.totalorder %v2004_v14, 17  ;;  %vm134_vm6 = vcmp.lt.s32.totalorder %v2004_v14, 18 }
   0x6   :  { %305 = vrot.lane.b32.xlu0 %v1835_v2, %s1784_s19  ;;  %299 = vrot.lane.b32.xlu1 %v1840_v3, %s1784_s19  ;;  %vm97_vm7 = vcmp.lt.s32.totalorder %v2004_v14, 19  ;;  %vm356_vm8 = vcmp.lt.s32.totalorder %v2004_v14, 109  ;;  %v2475_v13 = vld [vmem:[%s3551_s1 + $0xa0] sm:$0xff] }
   0xa   :  { %303 = vrot.lane.b32.xlu0 %v1849_v4, %s1784_s19  ;;  %295 = vrot.lane.b32.xlu1 %v1854_v5, %s1784_s19 }
   0xe   :  { %264 = vrot.lane.b32.xlu0 %v1821_v0, %s1785_s28  ;;  %268 = vrot.lane.b32.xlu1 %v1835_v2, %s1785_s28 }
  0x12   :  { %260 = vrot.lane.b32.xlu0 %v1826_v1, %s1785_s28  ;;  %262 = vrot.lane.b32.xlu1 %v1840_v3, %s1785_s28 }
  0x16   :  { %266 = vrot.lane.b32.xlu0 %v1849_v4, %s1785_s28  ;;  %258 = vrot.lane.b32.xlu1 %v1854_v5, %s1785_s28 }
  0x1a   :  { %227 = vrot.lane.b32.xlu0 %v1821_v0, %s1786_s29  ;;  %231 = vrot.lane.b32.xlu1 %v1835_v2, %s1786_s29 }
  0x1e   :  { %223 = vrot.lane.b32.xlu0 %v1826_v1, %s1786_s29  ;;  %225 = vrot.lane.b32.xlu1 %v1840_v3, %s1786_s29 }
  0x22   :  { %229 = vrot.lane.b32.xlu0 %v1849_v4, %s1786_s29  ;;  %221 = vrot.lane.b32.xlu1 %v1854_v5, %s1786_s29 }
  0x26   :  { %186 = vrot.lane.b32.xlu0 %v1826_v1, %s1787_s30  ;;  %190 = vrot.lane.b32.xlu1 %v1821_v0, %s1787_s30 }
  0x2a   :  { %206 = vrot.lane.b32.xlu0 %v1891_v6, %s1787_s30  ;;  %184 = vrot.lane.b32.xlu1 %v1854_v5, %s1787_s30 }
  0x2e   :  { %188 = vrot.lane.b32.xlu0 %v1840_v3, %s1787_s30  ;;  %204 = vrot.lane.b32.xlu1 %v1900_v7, %s1787_s30 }
  0x32   :  { %149 = vrot.lane.b32.xlu0 %v1826_v1, %s1788_s9  ;;  %153 = vrot.lane.b32.xlu1 %v1821_v0, %s1788_s9 }
  0x36   :  { %169 = vrot.lane.b32.xlu0 %v1891_v6, %s1788_s9  ;;  %147 = vrot.lane.b32.xlu1 %v1854_v5, %s1788_s9 }
  0x3a   :  { %151 = vrot.lane.b32.xlu0 %v1840_v3, %s1788_s9  ;;  %167 = vrot.lane.b32.xlu1 %v1900_v7, %s1788_s9 }
  0x3e   :  { %112 = vrot.lane.b32.xlu0 %v1826_v1, %s1789_s10  ;;  %116 = vrot.lane.b32.xlu1 %v1821_v0, %s1789_s10 }
  0x42   :  { %132 = vrot.lane.b32.xlu0 %v1891_v6, %s1789_s10  ;;  %110 = vrot.lane.b32.xlu1 %v1854_v5, %s1789_s10 }
  0x46   :  { %114 = vrot.lane.b32.xlu0 %v1840_v3, %s1789_s10  ;;  %130 = vrot.lane.b32.xlu1 %v1900_v7, %s1789_s10 }
  0x4a   :  { %73 = vrot.lane.b32.xlu0 %v1826_v1, %s1790_s11  ;;  %77 = vrot.lane.b32.xlu1 %v1821_v0, %s1790_s11 }
  0x4e   :  { %93 = vrot.lane.b32.xlu0 %v1891_v6, %s1790_s11  ;;  %71 = vrot.lane.b32.xlu1 %v1854_v5, %s1790_s11 }
  0x52   :  { %75 = vrot.lane.b32.xlu0 %v1840_v3, %s1790_s11  ;;  %91 = vrot.lane.b32.xlu1 %v1900_v7, %s1790_s11 }
  0x56   :  { %338 = vrot.lane.b32.xlu0 %v1821_v0, %s1791_s14  ;;  %342 = vrot.lane.b32.xlu1 %v1835_v2, %s1791_s14 }
  0x5a   :  { %334 = vrot.lane.b32.xlu0 %v1826_v1, %s1791_s14  ;;  %336 = vrot.lane.b32.xlu1 %v1840_v3, %s1791_s14 }
  0x5e   :  { %340 = vrot.lane.b32.xlu0 %v1849_v4, %s1791_s14  ;;  %332 = vrot.lane.b32.xlu1 %v1854_v5, %s1791_s14 }
  0x62   :  { %309 = vrot.lane.b32.xlu0 %v1966_v9, %s1784_s19  ;;  %313 = vrot.lane.b32.xlu1 %v1971_v10, %s1784_s19 }
  0x66   :  { %307 = vrot.lane.b32.xlu0 %v1980_v11, %s1784_s19  ;;  %311 = vrot.lane.b32.xlu1 %v1985_v12, %s1784_s19 }
  0x6a   :  { %272 = vrot.lane.b32.xlu0 %v1966_v9, %s1785_s28  ;;  %276 = vrot.lane.b32.xlu1 %v1971_v10, %s1785_s28 }
  0x6e   :  { %270 = vrot.lane.b32.xlu0 %v1980_v11, %s1785_s28  ;;  %274 = vrot.lane.b32.xlu1 %v1985_v12, %s1785_s28 }
  0x72   :  { %235 = vrot.lane.b32.xlu0 %v1966_v9, %s1786_s29  ;;  %239 = vrot.lane.b32.xlu1 %v1971_v10, %s1786_s29 }
  0x74   :  { %v302_v15 = vpop.permute.xlu0 %301  ;;  %v2006_v16 = vpop.permute.xlu1 %297 }
  0x75   :  { %v329_v20 = vsel %vm319_vm1, %v2006_v16, %v302_v15 }
  0x76   :  { %233 = vrot.lane.b32.xlu0 %v1980_v11, %s1786_s29  ;;  %237 = vrot.lane.b32.xlu1 %v1985_v12, %s1786_s29 }
  0x78   :  { %v2013_v17 = vpop.permute.xlu0 %305  ;;  %v300_v18 = vpop.permute.xlu1 %299 }
  0x79   :  { %v327_v19 = vsel %vm319_vm1, %v302_v15, %v2013_v17 }
  0x7a   :  { %418 = vmatprep.subr.mxu0 %v327_v19  ;;  %194 = vrot.lane.b32.xlu0 %v1835_v2, %s1787_s30 }
  0x7b   :  { %198 = vrot.lane.b32.xlu1 %v1966_v9, %s1787_s30  ;;  %419 = vmatpush1.msra.mxu0 %v329_v20 }
  0x7c   :  { %v2025_v21 = vpop.permute.xlu0 %303  ;;  %v2027_v22 = vpop.permute.xlu1 %295 }
  0x7d   :  { %v326_v23 = vsel %vm319_vm1, %v300_v18, %v2025_v21  ;;  %v328_v24 = vsel %vm319_vm1, %v2027_v22, %v300_v18 }
  0x7e   :  { %192 = vrot.lane.b32.xlu0 %v1849_v4, %s1787_s30  ;;  %420 = vmatprep.subr.mxu0 %v326_v23 }
  0x7f   :  { %196 = vrot.lane.b32.xlu1 %v1980_v11, %s1787_s30  ;;  %421 = vmatpush1.msra.mxu0 %v328_v24 }
  0x80   :  { %v265_v25 = vpop.permute.xlu0 %264  ;;  %v2040_v26 = vpop.permute.xlu1 %268 }
  0x81   :  { %v290_v27 = vsel %vm282_vm2, %v265_v25, %v2040_v26 }
  0x82   :  { %317 = vrot.lane.b32.xlu0 %v1891_v6, %s1784_s19  ;;  %422 = vmatprep.subr.mxu0 %v290_v27 }
  0x83   :  { %157 = vrot.lane.b32.xlu1 %v1835_v2, %s1788_s9 }
  0x84   :  { %v2049_v28 = vpop.permute.xlu0 %260  ;;  %v263_v29 = vpop.permute.xlu1 %262 }
  0x85   :  { %v292_v30 = vsel %vm282_vm2, %v2049_v28, %v265_v25 }
  0x86   :  { %161 = vrot.lane.b32.xlu0 %v1966_v9, %s1788_s9  ;;  %423 = vmatpush1.msra.mxu0 %v292_v30 }
  0x87   :  { %315 = vrot.lane.b32.xlu1 %v1900_v7, %s1784_s19 }
  0x88   :  { %v2058_v31 = vpop.permute.xlu0 %266  ;;  %v2060_v32 = vpop.permute.xlu1 %258 }
  0x89   :  { %v289_v33 = vsel %vm282_vm2, %v263_v29, %v2058_v31  ;;  %v291_v34 = vsel %vm282_vm2, %v2060_v32, %v263_v29 }
  0x8a   :  { %155 = vrot.lane.b32.xlu0 %v1849_v4, %s1788_s9  ;;  %424 = vmatprep.subr.mxu0 %v289_v33 }
  0x8b   :  { %159 = vrot.lane.b32.xlu1 %v1980_v11, %s1788_s9  ;;  %425 = vmatpush1.msra.mxu0 %v291_v34 }
  0x8c   :  { %v228_v35 = vpop.permute.xlu0 %227  ;;  %v2073_v36 = vpop.permute.xlu1 %231 }
  0x8d   :  { %v253_v37 = vsel %vm245_vm3, %v228_v35, %v2073_v36 }
  0x8e   :  { %280 = vrot.lane.b32.xlu0 %v1891_v6, %s1785_s28  ;;  %426 = vmatprep.subr.mxu0 %v253_v37 }
  0x8f   :  { %120 = vrot.lane.b32.xlu1 %v1835_v2, %s1789_s10 }
  0x90   :  { %v2082_v38 = vpop.permute.xlu0 %223  ;;  %v226_v39 = vpop.permute.xlu1 %225 }
  0x91   :  { %v255_v40 = vsel %vm245_vm3, %v2082_v38, %v228_v35 }
  0x92   :  { %124 = vrot.lane.b32.xlu0 %v1966_v9, %s1789_s10  ;;  %427 = vmatpush1.msra.mxu0 %v255_v40 }
  0x93   :  { %278 = vrot.lane.b32.xlu1 %v1900_v7, %s1785_s28 }
  0x94   :  { %v2091_v41 = vpop.permute.xlu0 %229  ;;  %v2093_v42 = vpop.permute.xlu1 %221 }
  0x95   :  { %v252_v43 = vsel %vm245_vm3, %v226_v39, %v2091_v41  ;;  %v254_v44 = vsel %vm245_vm3, %v2093_v42, %v226_v39 }
  0x96   :  { %118 = vrot.lane.b32.xlu0 %v1849_v4, %s1789_s10  ;;  %428 = vmatprep.subr.mxu0 %v252_v43 }
  0x97   :  { %122 = vrot.lane.b32.xlu1 %v1980_v11, %s1789_s10  ;;  %429 = vmatpush1.msra.mxu0 %v254_v44 }
  0x98   :  { %v187_v45 = vpop.permute.xlu0 %186  ;;  %430 = vmatprep.subr.mxu0 %v1821_v0  ;;  %v2106_v46 = vpop.permute.xlu1 %190 }
  0x99   :  { %431 = vmatpush1.msra.mxu0 %v1826_v1  ;;  %v218_v47 = vsel %vm208_vm4, %v187_v45, %v2106_v46 }
  0x9a   :  { %243 = vrot.lane.b32.xlu0 %v1891_v6, %s1786_s29  ;;  %432 = vmatprep.subr.mxu0 %v1840_v3 }
  0x9b   :  { %81 = vrot.lane.b32.xlu1 %v1835_v2, %s1790_s11  ;;  %433 = vmatpush1.msra.mxu0 %v1854_v5 }
  0x9c   :  { %v2119_v48 = vpop.permute.xlu0 %206  ;;  %434 = vmatprep.subr.mxu0 %v218_v47  ;;  %v185_v49 = vpop.permute.xlu1 %184 }
  0x9d   :  { %v220_v50 = vsel %vm208_vm4, %v2119_v48, %v187_v45 }
  0x9e   :  { %85 = vrot.lane.b32.xlu0 %v1966_v9, %s1790_s11  ;;  %435 = vmatpush1.msra.mxu0 %v220_v50 }
  0x9f   :  { %241 = vrot.lane.b32.xlu1 %v1900_v7, %s1786_s29 }
  0xa0   :  { %v2128_v51 = vpop.permute.xlu0 %188  ;;  %v2130_v52 = vpop.permute.xlu1 %204 }
  0xa1   :  { %v217_v53 = vsel %vm208_vm4, %v185_v49, %v2128_v51  ;;  %v219_v54 = vsel %vm208_vm4, %v2130_v52, %v185_v49 }
  0xa2   :  { %79 = vrot.lane.b32.xlu0 %v1849_v4, %s1790_s11  ;;  %436 = vmatprep.subr.mxu0 %v217_v53 }
  0xa3   :  { %83 = vrot.lane.b32.xlu1 %v1980_v11, %s1790_s11  ;;  %437 = vmatpush1.msra.mxu0 %v219_v54 }
  0xa4   :  { %v150_v55 = vpop.permute.xlu0 %149  ;;  %v2143_v56 = vpop.permute.xlu1 %153 }
  0xa5   :  { %v181_v57 = vsel %vm171_vm5, %v150_v55, %v2143_v56 }
  0xa6   :  { %346 = vrot.lane.b32.xlu0 %v1966_v9, %s1791_s14  ;;  %438 = vmatprep.subr.mxu0 %v181_v57 }
  0xa7   :  { %350 = vrot.lane.b32.xlu1 %v1971_v10, %s1791_s14 }
  0xa8   :  { %v2152_v58 = vpop.permute.xlu0 %169  ;;  %v148_v59 = vpop.permute.xlu1 %147 }
  0xa9   :  { %v183_v60 = vsel %vm171_vm5, %v2152_v58, %v150_v55 }
  0xaa   :  { %202 = vrot.lane.b32.xlu0 %v1971_v10, %s1787_s30  ;;  %439 = vmatpush1.msra.mxu0 %v183_v60  ;;  %v2257_v60 = vld [vmem:[%s3551_s1] sm:$0xff] }
  0xab   :  { %344 = vrot.lane.b32.xlu1 %v1980_v11, %s1791_s14 }
  0xac   :  { %v2161_v61 = vpop.permute.xlu0 %151  ;;  %v2163_v62 = vpop.permute.xlu1 %167 }
  0xad   :  { %v180_v63 = vsel %vm171_vm5, %v148_v59, %v2161_v61  ;;  %v182_v0 = vsel %vm171_vm5, %v2163_v62, %v148_v59 }
  0xae   :  { %348 = vrot.lane.b32.xlu0 %v1985_v12, %s1791_s14  ;;  %440 = vmatprep.subr.mxu0 %v180_v63  ;;  %v2262_v63 = vld [vmem:[%s3551_s1 + $0x18] sm:$0xff] }
  0xaf   :  { %200 = vrot.lane.b32.xlu1 %v1985_v12, %s1787_s30  ;;  %441 = vmatpush1.msra.mxu0 %v182_v0 }
  0xb0   :  { %v113_v1 = vpop.permute.xlu0 %112  ;;  %v2176_v3 = vpop.permute.xlu1 %116 }
  0xb1   :  { %v144_v5 = vsel %vm134_vm6, %v113_v1, %v2176_v3 }
  0xb2   :  { %165 = vrot.lane.b32.xlu0 %v1971_v10, %s1788_s9  ;;  %442 = vmatprep.subr.mxu0 %v144_v5 }
  0xb3   :  { %163 = vrot.lane.b32.xlu1 %v1985_v12, %s1788_s9 }
  0xb4   :  { %v2185_v15 = vpop.permute.xlu0 %132  ;;  %v111_v18 = vpop.permute.xlu1 %110 }
  0xb5   :  { %v146_v19 = vsel %vm134_vm6, %v2185_v15, %v113_v1 }
  0xb6   :  { %128 = vrot.lane.b32.xlu0 %v1971_v10, %s1789_s10  ;;  %443 = vmatpush1.msra.mxu0 %v146_v19  ;;  %v2278_v19 = vld [vmem:[%s3551_s1 + $0x10] sm:$0xff] }
  0xb7   :  { %126 = vrot.lane.b32.xlu1 %v1985_v12, %s1789_s10 }
  0xb8   :  { %v2194_v20 = vpop.permute.xlu0 %114  ;;  %v2196_v23 = vpop.permute.xlu1 %130 }
  0xb9   :  { %v143_v24 = vsel %vm134_vm6, %v111_v18, %v2194_v20  ;;  %v145_v25 = vsel %vm134_vm6, %v2196_v23, %v111_v18 }
  0xba   :  { %89 = vrot.lane.b32.xlu0 %v1971_v10, %s1790_s11  ;;  %444 = vmatprep.subr.mxu0 %v143_v24  ;;  %v2283_v24 = vld [vmem:[%s3551_s1 + $0x28] sm:$0xff] }
  0xbb   :  { %87 = vrot.lane.b32.xlu1 %v1985_v12, %s1790_s11  ;;  %445 = vmatpush1.msra.mxu0 %v145_v25 }
  0xbc   :  { %v74_v27 = vpop.permute.xlu0 %73  ;;  %v2209_v29 = vpop.permute.xlu1 %77 }
  0xbd   :  { %v107_v30 = vsel %vm97_vm7, %v74_v27, %v2209_v29 }
  0xbe   :  { %354 = vrot.lane.b32.xlu0 %v1891_v6, %s1791_s14  ;;  %446 = vmatprep.subr.mxu0 %v107_v30 }
  0xbf   :  { %352 = vrot.lane.b32.xlu1 %v1900_v7, %s1791_s14 }
  0xc0   :  { %v2218_v33 = vpop.permute.xlu0 %93  ;;  %v72_v34 = vpop.permute.xlu1 %71 }
  0xc1   :  { %v109_v35 = vsel %vm97_vm7, %v2218_v33, %v74_v27 }
  0xc2   :  { %447 = vmatpush1.msra.mxu0 %v109_v35  ;;  %v2304_v35 = vld [vmem:[%s3551_s1 + $0x38] sm:$0xff] }
  0xc4   :  { %v2223_v37 = vpop.permute.xlu0 %75  ;;  %v2225_v39 = vpop.permute.xlu1 %91 }
  0xc5   :  { %v106_v40 = vsel %vm97_vm7, %v72_v34, %v2223_v37  ;;  %v108_v43 = vsel %vm97_vm7, %v2225_v39, %v72_v34  ;;  %v2299_v34 = vld [vmem:[%s3551_s1 + $0x20] sm:$0xff] }
  0xc6   :  { %448 = vmatprep.subr.mxu0 %v106_v40 }
  0xc7   :  { %449 = vmatpush1.msra.mxu0 %v108_v43 }
  0xc8   :  { %v339_v44 = vpop.permute.xlu0 %338  ;;  %v2234_v45 = vpop.permute.xlu1 %342 }
  0xc9   :  { %v364_v47 = vsel %vm356_vm8, %v339_v44, %v2234_v45 }
  0xca   :  { %478 = vmatprep.subr.mxu0 %v364_v47  ;;  %v2320_v47 = vld [vmem:[%s3551_s1 + $0x30] sm:$0xff] }
  0xcc   :  { %v2239_v49 = vpop.permute.xlu0 %334  ;;  %v337_v50 = vpop.permute.xlu1 %336 }
  0xcd   :  { %v366_v53 = vsel %vm356_vm8, %v2239_v49, %v339_v44 }
  0xce   :  { %479 = vmatpush2.msra.mxu0 %v366_v53 }
  0xd0   :  { %v2244_v54 = vpop.permute.xlu0 %340  ;;  %v2246_v55 = vpop.permute.xlu1 %332 }
  0xd1   :  { %v363_v57 = vsel %vm356_vm8, %v337_v50, %v2244_v54  ;;  %v365_v59 = vsel %vm356_vm8, %v2246_v55, %v337_v50  ;;  %v2325_v50 = vld [vmem:[%s3551_s1 + $0x48] sm:$0xff] }
  0xd2   :  { %480 = vmatprep.subr.mxu0 %v363_v57 }
  0xd3   :  { %481 = vmatpush2.msra.mxu0 %v365_v59 }
  0xd4   :  { %v310_v0 = vpop.permute.xlu0 %309  ;;  %483 = vmatmul.mubr.f32.vlgmr.msra.gmra.mxu0 %v2257_v60  ;;  %v2265_v1 = vpop.permute.xlu1 %313 }
  0xd5   :  { %v323_v5 = vsel %vm319_vm1, %v310_v0, %v2265_v1  ;;  %1696 = vmatprep.mubr.msk.f32.mxu0 %vm369_vm0, %v2262_v63  ;;  %v325_v18 = vsel %vm319_vm1, %v2013_v17, %v310_v0  ;;  %v2341_v0 = vld [vmem:[%s3551_s1 + $0x40] sm:$0xff] }
  0xd6   :  { %579 = vmatprep.subr.mxu1 %v323_v5  ;;  %v2346_v5 = vld [vmem:[%s3551_s1 + $0x58] sm:$0xff] }
  0xd7   :  { %580 = vmatpush1.msra.mxu1 %v325_v18 }
  0xd8   :  { %v308_v25 = vpop.permute.xlu0 %307  ;;  %489 = vmatmul.mubr.f32.gmra.mxu0 %v2278_v19  ;;  %v2286_v27 = vpop.permute.xlu1 %311 }
  0xd9   :  { %v322_v17 = vsel %vm319_vm1, %v308_v25, %v2286_v27  ;;  %1697 = vmatprep.mubr.msk.f32.mxu0 %vm369_vm0, %v2283_v24  ;;  %v324_v30 = vsel %vm319_vm1, %v2025_v21, %v308_v25 }
  0xda   :  { %581 = vmatprep.subr.mxu1 %v322_v17 }
  0xdb   :  { %582 = vmatpush1.msra.mxu1 %v324_v30  ;;  %v2362_v30 = vld [vmem:[%s3551_s1 + $0x50] sm:$0xff] }
  0xdc   :  { %v273_v40 = vpop.permute.xlu0 %272  ;;  %495 = vmatmul.mubr.f32.gmra.mxu0 %v2299_v34  ;;  %v2307_v43 = vpop.permute.xlu1 %276 }
  0xdd   :  { %v286_v21 = vsel %vm282_vm2, %v273_v40, %v2307_v43  ;;  %1698 = vmatprep.mubr.msk.f32.mxu0 %vm369_vm0, %v2304_v35  ;;  %v288_v44 = vsel %vm282_vm2, %v2040_v26, %v273_v40  ;;  %v2367_v40 = vld [vmem:[%s3551_s1 + $0x68] sm:$0xff] }
  0xde   :  { %583 = vmatprep.subr.mxu1 %v286_v21 }
  0xdf   :  { %584 = vmatpush1.msra.mxu1 %v288_v44 }
  0xe0   :  { %v271_v53 = vpop.permute.xlu0 %270  ;;  %501 = vmatmul.mubr.f32.gmra.mxu0 %v2320_v47  ;;  %v2328_v57 = vpop.permute.xlu1 %274 }
  0xe1   :  { %v285_v26 = vsel %vm282_vm2, %v271_v53, %v2328_v57  ;;  %1699 = vmatprep.mubr.msk.f32.mxu0 %vm369_vm0, %v2325_v50  ;;  %v287_v59 = vsel %vm282_vm2, %v2058_v31, %v271_v53 }
  0xe2   :  { %585 = vmatprep.subr.mxu1 %v285_v26  ;;  %v2383_v26 = vld [vmem:[%s3551_s1 + $0x60] sm:$0xff] }
  0xe3   :  { %586 = vmatpush1.msra.mxu1 %v287_v59  ;;  %v2388_v59 = vld [vmem:[%s3551_s1 + $0x78] sm:$0xff] }
  0xe4   :  { %v236_v18 = vpop.permute.xlu0 %235  ;;  %507 = vmatmul.mubr.f32.gmra.mxu0 %v2341_v0  ;;  %v2349_v25 = vpop.permute.xlu1 %239 }
  0xe5   :  { %v249_v31 = vsel %vm245_vm3, %v236_v18, %v2349_v25  ;;  %1700 = vmatprep.mubr.msk.f32.mxu0 %vm369_vm0, %v2346_v5  ;;  %v251_v17 = vsel %vm245_vm3, %v2073_v36, %v236_v18 }
  0xe6   :  { %587 = vmatprep.subr.mxu1 %v249_v31 }
  0xe7   :  { %588 = vmatpush1.msra.mxu1 %v251_v17  ;;  %v2406_v17 = vld [vmem:[%s3551_s1 + $0x88] sm:$0xff] }
  0xe8   :  { %v234_v21 = vpop.permute.xlu0 %233  ;;  %513 = vmatmul.mubr.f32.gmra.mxu0 %v2362_v30  ;;  %v2370_v44 = vpop.permute.xlu1 %237 }
  0xe9   :  { %v248_v36 = vsel %vm245_vm3, %v234_v21, %v2370_v44  ;;  %1701 = vmatprep.mubr.msk.f32.mxu0 %vm369_vm0, %v2367_v40  ;;  %v250_v53 = vsel %vm245_vm3, %v2091_v41, %v234_v21  ;;  %v2400_v41 = vld [vmem:[%s3551_s1 + $0x70] sm:$0xff] }
  0xea   :  { %589 = vmatprep.subr.mxu1 %v248_v36  ;;  %v2426_v36 = vld [vmem:[%s3551_s1 + $0x80] sm:$0xff] }
  0xeb   :  { %590 = vmatpush1.msra.mxu1 %v250_v53 }
  0xec   :  { %v195_v18 = vpop.permute.xlu0 %194  ;;  %519 = vmatmul.mubr.f32.gmra.mxu0 %v2383_v26  ;;  %591 = vmatprep.subr.mxu1 %v1966_v9 }
  0xed   :  { %v2392_v31 = vpop.permute.xlu1 %198  ;;  %592 = vmatpush1.msra.mxu1 %v1835_v2  ;;  %1702 = vmatprep.mubr.msk.f32.mxu0 %vm369_vm0, %v2388_v59  ;;  %v216_v21 = vsel %vm208_vm4, %v2106_v46, %v195_v18  ;;  %v2434_v46 = vld [vmem:[%s3551_s1 + $0x98] sm:$0xff] }
  0xee   :  { %593 = vmatprep.subr.mxu1 %v1980_v11  ;;  %v214_v2 = vsel %vm208_vm4, %v195_v18, %v2392_v31 }
  0xef   :  { %594 = vmatpush1.msra.mxu1 %v1849_v4 }
  0xf0   :  { %v193_v9 = vpop.permute.xlu0 %192  ;;  %525 = vmatmul.mubr.f32.gmra.mxu0 %v2400_v41  ;;  %595 = vmatprep.subr.mxu1 %v214_v2 }
  0xf1   :  { %v2416_v11 = vpop.permute.xlu1 %196  ;;  %596 = vmatpush1.msra.mxu1 %v216_v21  ;;  %1703 = vmatprep.mubr.msk.f32.mxu0 %vm369_vm0, %v2406_v17  ;;  %v215_v4 = vsel %vm208_vm4, %v2128_v51, %v193_v9 }
  0xf2   :  { %v213_v53 = vsel %vm208_vm4, %v193_v9, %v2416_v11  ;;  %v2448_v9 = vld [vmem:[%s3551_s1 + $0x90] sm:$0xff] }
  0xf3   :  { %597 = vmatprep.subr.mxu1 %v213_v53 }
  0xf4   :  { %598 = vmatpush1.msra.mxu1 %v215_v4  ;;  %v318_v18 = vpop.permute.xlu0 %317  ;;  %531 = vmatmul.mubr.f32.gmra.mxu0 %v2426_v36  ;;  %v2453_v4 = vld [vmem:[%s3551_s1 + $0xa8] sm:$0xff] }
  0xf5   :  { %v321_v51 = vsel %vm319_vm1, %v2265_v1, %v318_v18  ;;  %v158_v2 = vpop.permute.xlu1 %157  ;;  %v331_v21 = vsel %vm319_vm1, %v318_v18, %v2006_v16  ;;  %1704 = vmatprep.mubr.msk.f32.mxu0 %vm369_vm0, %v2434_v46 }
  0xf6   :  { %740 = vmatprep.subr.mxu0 %v331_v21  ;;  %v179_v21 = vsel %vm171_vm5, %v2143_v56, %v158_v2 }
  0xf7   :  { %741 = vmatpush1.msra.mxu0 %v321_v51 }
  0xf8   :  { %v2455_v1 = vpop.permute.xlu0 %161  ;;  %537 = vmatmul.mubr.f32.gmra.mxu0 %v2448_v9 }
  0xf9   :  { %v316_v16 = vpop.permute.xlu1 %315  ;;  %v177_v53 = vsel %vm171_vm5, %v158_v2, %v2455_v1  ;;  %1705 = vmatprep.mubr.msk.f32.mxu0 %vm369_vm0, %v2453_v4 }
  0xfa   :  { %v320_v18 = vsel %vm319_vm1, %v2286_v27, %v316_v16  ;;  %599 = vmatprep.subr.mxu1 %v177_v53  ;;  %v330_v51 = vsel %vm319_vm1, %v316_v16, %v2027_v22  ;;  %v2480_v27 = vld [vmem:[%s3551_s1 + $0xb8] sm:$0xff]  ;;  %v2496_v16 = vld [vmem:[%s3551_s1 + $0xb0] sm:$0xff] }
  0xfb   :  { %742 = vmatprep.subr.mxu0 %v330_v51  ;;  %600 = vmatpush1.msra.mxu1 %v179_v21 }
  0xfc   :  { %743 = vmatpush1.msra.mxu0 %v320_v18  ;;  %v156_v53 = vpop.permute.xlu0 %155  ;;  %v2501_v18 = vld [vmem:[%s3551_s1 + $0xc8] sm:$0xff] }
  0xfd   :  { %543 = vmatmul.mubr.f32.gmra.mxu0 %v2475_v13  ;;  %v2483_v22 = vpop.permute.xlu1 %159  ;;  %v178_v56 = vsel %vm171_vm5, %v2161_v61, %v156_v53  ;;  %3583 = vst [vmem:[#allocation3_spill] sm:$0xff] %v2501_v18 }
  0xfe   :  { %v176_v2 = vsel %vm171_vm5, %v156_v53, %v2483_v22  ;;  %1706 = vmatprep.mubr.msk.f32.mxu0 %vm369_vm0, %v2480_v27 }
  0xff   :  { %601 = vmatprep.subr.mxu1 %v176_v2 }
 0x100   :  { %602 = vmatpush1.msra.mxu1 %v178_v56  ;;  %v281_v61 = vpop.permute.xlu0 %280  ;;  %v2515_v56 = vld [vmem:[%s3551_s1 + $0xc0] sm:$0xff] }
 0x101   :  { %v284_v51 = vsel %vm282_vm2, %v2307_v43, %v281_v61  ;;  %549 = vmatmul.mubr.f32.gmra.mxu0 %v2496_v16  ;;  %v121_v21 = vpop.permute.xlu1 %120  ;;  %v294_v53 = vsel %vm282_vm2, %v281_v61, %v2049_v28  ;;  %3584 = vst [vmem:[#allocation4_spill] sm:$0xff] %v2515_v56  ;;  %v2520_v43 = vld [vmem:[%s3551_s1 + $0xd8] sm:$0xff] }
 0x102   :  { %744 = vmatprep.subr.mxu0 %v294_v53  ;;  %1707 = vmatprep.mubr.msk.f32.mxu0 %vm369_vm0, %v2501_v18  ;;  %v2542_v18 = vld [vmem:[%s3551_s1 + $0xd0] sm:$0xff] }
 0x103   :  { %745 = vmatpush1.msra.mxu0 %v284_v51 }
 0x104   :  { %v2522_v2 = vpop.permute.xlu0 %124 }
 0x105   :  { %555 = vmatmul.mubr.f32.gmra.mxu0 %v2515_v56  ;;  %v279_v28 = vpop.permute.xlu1 %278  ;;  %v140_v61 = vsel %vm134_vm6, %v121_v21, %v2522_v2  ;;  %v142_v56 = vsel %vm134_vm6, %v2176_v3, %v121_v21 }
 0x106   :  { %v283_v53 = vsel %vm282_vm2, %v2328_v57, %v279_v28  ;;  %603 = vmatprep.subr.mxu1 %v140_v61  ;;  %v293_v51 = vsel %vm282_vm2, %v279_v28, %v2060_v32  ;;  %1708 = vmatprep.mubr.msk.f32.mxu0 %vm369_vm0, %v2520_v43  ;;  %v2547_v57 = vld [vmem:[%s3551_s1 + $0xe8] sm:$0xff]  ;;  %v2568_v61 = vld [vmem:[%s3551_s1 + $0xf8] sm:$0xff] }
 0x107   :  { %746 = vmatprep.subr.mxu0 %v293_v51  ;;  %604 = vmatpush1.msra.mxu1 %v142_v56  ;;  %v2563_v56 = vld [vmem:[%s3551_s1 + $0xe0] sm:$0xff] }
 0x108   :  { %747 = vmatpush1.msra.mxu0 %v283_v53  ;;  %v119_v32 = vpop.permute.xlu0 %118  ;;  %3585 = vst [vmem:[#allocation5_spill] sm:$0xff] %v2563_v56 }
 0x109   :  { %561 = vmatmul.mubr.f32.gmra.mxu0 %v2542_v18  ;;  %v2550_v28 = vpop.permute.xlu1 %122  ;;  %v141_v3 = vsel %vm134_vm6, %v2194_v20, %v119_v32 }
 0x10a   :  { %v139_v21 = vsel %vm134_vm6, %v119_v32, %v2550_v28  ;;  %1709 = vmatprep.mubr.msk.f32.mxu0 %vm369_vm0, %v2547_v57 }
 0x10b   :  { %605 = vmatprep.subr.mxu1 %v139_v21 }
 0x10c   :  { %606 = vmatpush1.msra.mxu1 %v141_v3  ;;  %v244_v20 = vpop.permute.xlu0 %243  ;;  %v2582_v3 = vld [vmem:[%s3551_s1 + $0xf0] sm:$0xff] }
 0x10d   :  { %v247_v53 = vsel %vm245_vm3, %v2349_v25, %v244_v20  ;;  %567 = vmatmul.mubr.f32.gmra.mxu0 %v2563_v56  ;;  %v82_v51 = vpop.permute.xlu1 %81  ;;  %v257_v32 = vsel %vm245_vm3, %v244_v20, %v2082_v38  ;;  %3586 = vst [vmem:[#allocation6_spill] sm:$0xff] %v2582_v3 }
 0x10e   :  { %748 = vmatprep.subr.mxu0 %v257_v32  ;;  %1710 = vmatprep.mubr.msk.f32.mxu0 %vm369_vm0, %v2568_v61 }
 0x10f   :  { %749 = vmatpush1.msra.mxu0 %v247_v53  ;;  %v105_v53 = vsel %vm97_vm7, %v2209_v29, %v82_v51 }
 0x110   :  { %v2584_v21 = vpop.permute.xlu0 %85 }
 0x111   :  { %573 = vmatmul.mubr.f32.gmra.mxu0 %v2582_v3  ;;  %v242_v25 = vpop.permute.xlu1 %241  ;;  %v103_v56 = vsel %vm97_vm7, %v82_v51, %v2584_v21 }
 0x112   :  { %v246_v38 = vsel %vm245_vm3, %v2370_v44, %v242_v25  ;;  %607 = vmatprep.subr.mxu1 %v103_v56  ;;  %v256_v20 = vsel %vm245_vm3, %v242_v25, %v2093_v42  ;;  %1727 = vmatprep.mubr.msk.f32.mxu0 %vm369_vm0, %v1945_v8 }
 0x113   :  { %750 = vmatprep.subr.mxu0 %v256_v20  ;;  %608 = vmatpush1.msra.mxu1 %v105_v53 }
 0x114   :  { %751 = vmatpush1.msra.mxu0 %v246_v38  ;;  %v80_v32 = vpop.permute.xlu0 %79 }
 0x115   :  { %v2601_v3 = vpop.permute.xlu1 %83  ;;  %v104_v44 = vsel %vm97_vm7, %v2223_v37, %v80_v32  ;;  %752 = vmatprep.subr.mxu0 %v1891_v6 }
 0x116   :  { %v102_v42 = vsel %vm97_vm7, %v80_v32, %v2601_v3  ;;  %753 = vmatpush1.msra.mxu0 %v1971_v10 }
 0x117   :  { %609 = vmatprep.subr.mxu1 %v102_v42  ;;  %754 = vmatprep.subr.mxu0 %v1900_v7 }
 0x118   :  { %610 = vmatpush1.msra.mxu1 %v104_v44  ;;  %v347_v8 = vpop.permute.xlu0 %346  ;;  %755 = vmatpush1.msra.mxu0 %v1985_v12 }
 0x119   :  { %v351_v29 = vpop.permute.xlu1 %350  ;;  %v362_v37 = vsel %vm356_vm8, %v2234_v45, %v347_v8 }
 0x11a   :  { %v360_v6 = vsel %vm356_vm8, %v347_v8, %v351_v29 }
 0x11b   :  { %639 = vmatprep.subr.mxu1 %v360_v6 }
 0x11c   :  { %640 = vmatpush2.msra.mxu1 %v362_v37  ;;  %v203_v56 = vpop.permute.xlu0 %202 }
 0x11d   :  { %v212_v10 = vsel %vm208_vm4, %v2392_v31, %v203_v56  ;;  %v345_v7 = vpop.permute.xlu1 %344  ;;  %v210_v12 = vsel %vm208_vm4, %v203_v56, %v2119_v48 }
 0x11e   :  { %756 = vmatprep.subr.mxu0 %v210_v12  ;;  %v361_v48 = vsel %vm356_vm8, %v2244_v54, %v345_v7  ;;  %v3591_v12 = vlaneseq }
 0x11f   :  { %757 = vmatpush1.msra.mxu0 %v212_v10 }
 0x120   :  { %v349_v51 = vpop.permute.xlu0 %348 }
 0x121   :  { %v201_v25 = vpop.permute.xlu1 %200  ;;  %v359_v45 = vsel %vm356_vm8, %v345_v7, %v349_v51 }
 0x122   :  { %v211_v38 = vsel %vm208_vm4, %v2416_v11, %v201_v25  ;;  %641 = vmatprep.subr.mxu1 %v359_v45  ;;  %v209_v31 = vsel %vm208_vm4, %v201_v25, %v2130_v52 }
 0x123   :  { %758 = vmatprep.subr.mxu0 %v209_v31  ;;  %642 = vmatpush2.msra.mxu1 %v361_v48  ;;  %v2818_v48 = vld [vmem:[%s3552_s3] sm:$0x3f] }
 0x124   :  { %759 = vmatpush1.msra.mxu0 %v211_v38  ;;  %v166_v20 = vpop.permute.xlu0 %165  ;;  %644 = vmatmul.mubr.f32.vlgmr.msra.gmra.mxu1 %v2257_v60 }
 0x125   :  { %v175_v53 = vsel %vm171_vm5, %v2455_v1, %v166_v20  ;;  %v164_v11 = vpop.permute.xlu1 %163  ;;  %v173_v32 = vsel %vm171_vm5, %v166_v20, %v2152_v58  ;;  %1712 = vmatprep.mubr.msk.f32.mxu1 %vm369_vm0, %v2262_v63 }
 0x126   :  { %760 = vmatprep.subr.mxu0 %v173_v32  ;;  %v172_v52 = vsel %vm171_vm5, %v164_v11, %v2163_v62  ;;  %v174_v54 = vsel %vm171_vm5, %v2483_v22, %v164_v11 }
 0x127   :  { %761 = vmatpush1.msra.mxu0 %v175_v53 }
 0x128   :  { %v129_v44 = vpop.permute.xlu0 %128  ;;  %650 = vmatmul.mubr.f32.gmra.mxu1 %v2278_v19  ;;  %762 = vmatprep.subr.mxu0 %v172_v52 }
 0x129   :  { %v138_v58 = vsel %vm134_vm6, %v2522_v2, %v129_v44  ;;  %v127_v1 = vpop.permute.xlu1 %126  ;;  %763 = vmatpush1.msra.mxu0 %v174_v54  ;;  %v136_v42 = vsel %vm134_vm6, %v129_v44, %v2185_v15  ;;  %1713 = vmatprep.mubr.msk.f32.mxu1 %vm369_vm0, %v2283_v24 }
 0x12a   :  { %764 = vmatprep.subr.mxu0 %v136_v42  ;;  %v135_v62 = vsel %vm134_vm6, %v127_v1, %v2196_v23  ;;  %v137_v22 = vsel %vm134_vm6, %v2550_v28, %v127_v1 }
 0x12b   :  { %765 = vmatpush1.msra.mxu0 %v138_v58 }
 0x12c   :  { %v90_v2 = vpop.permute.xlu0 %89  ;;  %656 = vmatmul.mubr.f32.gmra.mxu1 %v2299_v34  ;;  %766 = vmatprep.subr.mxu0 %v135_v62 }
 0x12d   :  { %v101_v15 = vsel %vm97_vm7, %v2584_v21, %v90_v2  ;;  %v88_v8 = vpop.permute.xlu1 %87  ;;  %767 = vmatpush1.msra.mxu0 %v137_v22  ;;  %v99_v37 = vsel %vm97_vm7, %v90_v2, %v2218_v33  ;;  %1714 = vmatprep.mubr.msk.f32.mxu1 %vm369_vm0, %v2304_v35 }
 0x12e   :  { %768 = vmatprep.subr.mxu0 %v99_v37  ;;  %v98_v23 = vsel %vm97_vm7, %v88_v8, %v2225_v39  ;;  %v100_v28 = vsel %vm97_vm7, %v2601_v3, %v88_v8 }
 0x12f   :  { %769 = vmatpush1.msra.mxu0 %v101_v15 }
 0x130   :  { %v355_v21 = vpop.permute.xlu0 %354  ;;  %662 = vmatmul.mubr.f32.gmra.mxu1 %v2320_v47  ;;  %770 = vmatprep.subr.mxu0 %v98_v23 }
 0x131   :  { %v358_v33 = vsel %vm356_vm8, %v351_v29, %v355_v21  ;;  %v353_v6 = vpop.permute.xlu1 %352  ;;  %771 = vmatpush1.msra.mxu0 %v100_v28  ;;  %v368_v56 = vsel %vm356_vm8, %v355_v21, %v2239_v49  ;;  %1715 = vmatprep.mubr.msk.f32.mxu1 %vm369_vm0, %v2325_v50  ;;  %v3587_v49 = vld [vmem:[#allocation3_spill] sm:$0xff] }
 0x132   :  { %800 = vmatprep.subr.mxu0 %v368_v56  ;;  %v367_v39 = vsel %vm356_vm8, %v353_v6, %v2246_v55  ;;  %v357_v3 = vsel %vm356_vm8, %v349_v51, %v353_v6  ;;  %v3588_v55 = vld [vmem:[#allocation4_spill] sm:$0xff]  ;;  %v2812_v51 = vshrl.u32 %v3591_v12, 7 }
 0x133   :  { %801 = vmatpush2.msra.mxu0 %v358_v33 }
 0x134   :  { %668 = vmatmul.mubr.f32.gmra.mxu1 %v2341_v0  ;;  %802 = vmatprep.subr.mxu0 %v367_v39  ;;  %v1000_v38 = vsub.s32 0, %v2812_v51  ;;  %v1004_v20 = vsub.s32 1, %v2812_v51  ;;  %v1012_v14 = vsub.s32 3, %v2812_v51 }
 0x135   :  { %803 = vmatpush2.msra.mxu0 %v357_v3  ;;  %1716 = vmatprep.mubr.msk.f32.mxu1 %vm369_vm0, %v2346_v5 }
 0x136   :  { %805 = vmatmul.mubr.f32.vlgmr.msra.gmra.mxu0 %v2257_v60  ;;  %v3589_v60 = vld [vmem:[#allocation5_spill] sm:$0xff]  ;;  %v2822_v52 = vrot.slane %v2818_v48, %v1000_v38  ;;  %v2825_v58 = vrot.slane %v2818_v48, %v1004_v20 }
 0x137   :  { %1728 = vmatprep.mubr.msk.f32.mxu0 %vm369_vm0, %v2262_v63  ;;  %v3590_v63 = vld [vmem:[#allocation6_spill] sm:$0xff] }
 0x138   :  { %674 = vmatmul.mubr.f32.gmra.mxu1 %v2362_v30 }
 0x139   :  { %1717 = vmatprep.mubr.msk.f32.mxu1 %vm369_vm0, %v2367_v40 }
 0x13a   :  { %811 = vmatmul.mubr.f32.gmra.mxu0 %v2278_v19 }
 0x13b   :  { %1729 = vmatprep.mubr.msk.f32.mxu0 %vm369_vm0, %v2283_v24 }
 0x13c   :  { %680 = vmatmul.mubr.f32.gmra.mxu1 %v2383_v26 }
 0x13d   :  { %1718 = vmatprep.mubr.msk.f32.mxu1 %vm369_vm0, %v2388_v59 }
 0x13e   :  { %817 = vmatmul.mubr.f32.gmra.mxu0 %v2299_v34 }
 0x13f   :  { %1730 = vmatprep.mubr.msk.f32.mxu0 %vm369_vm0, %v2304_v35 }
 0x140   :  { %686 = vmatmul.mubr.f32.gmra.mxu1 %v2400_v41 }
 0x141   :  { %1719 = vmatprep.mubr.msk.f32.mxu1 %vm369_vm0, %v2406_v17 }
 0x142   :  { %823 = vmatmul.mubr.f32.gmra.mxu0 %v2320_v47 }
 0x143   :  { %1731 = vmatprep.mubr.msk.f32.mxu0 %vm369_vm0, %v2325_v50 }
 0x144   :  { %692 = vmatmul.mubr.f32.gmra.mxu1 %v2426_v36 }
 0x145   :  { %1720 = vmatprep.mubr.msk.f32.mxu1 %vm369_vm0, %v2434_v46 }
 0x146   :  { %829 = vmatmul.mubr.f32.gmra.mxu0 %v2341_v0 }
 0x147   :  { %1732 = vmatprep.mubr.msk.f32.mxu0 %vm369_vm0, %v2346_v5 }
 0x148   :  { %698 = vmatmul.mubr.f32.gmra.mxu1 %v2448_v9 }
 0x149   :  { %1721 = vmatprep.mubr.msk.f32.mxu1 %vm369_vm0, %v2453_v4 }
 0x14a   :  { %835 = vmatmul.mubr.f32.gmra.mxu0 %v2362_v30 }
 0x14b   :  { %1733 = vmatprep.mubr.msk.f32.mxu0 %vm369_vm0, %v2367_v40 }
 0x14c   :  { %704 = vmatmul.mubr.f32.gmra.mxu1 %v2475_v13 }
 0x14d   :  { %1722 = vmatprep.mubr.msk.f32.mxu1 %vm369_vm0, %v2480_v27 }
 0x14e   :  { %841 = vmatmul.mubr.f32.gmra.mxu0 %v2383_v26 }
 0x14f   :  { %1734 = vmatprep.mubr.msk.f32.mxu0 %vm369_vm0, %v2388_v59 }
 0x150   :  { %710 = vmatmul.mubr.f32.gmra.mxu1 %v2496_v16 }
 0x151   :  { %1723 = vmatprep.mubr.msk.f32.mxu1 %vm369_vm0, %v3587_v49 }
 0x152   :  { %847 = vmatmul.mubr.f32.gmra.mxu0 %v2400_v41 }
 0x153   :  { %1735 = vmatprep.mubr.msk.f32.mxu0 %vm369_vm0, %v2406_v17 }
 0x154   :  { %716 = vmatmul.mubr.f32.gmra.mxu1 %v3588_v55 }
 0x155   :  { %1724 = vmatprep.mubr.msk.f32.mxu1 %vm369_vm0, %v2520_v43 }
 0x156   :  { %853 = vmatmul.mubr.f32.gmra.mxu0 %v2426_v36 }
 0x157   :  { %1736 = vmatprep.mubr.msk.f32.mxu0 %vm369_vm0, %v2434_v46 }
 0x158   :  { %722 = vmatmul.mubr.f32.gmra.mxu1 %v2542_v18 }
 0x159   :  { %1725 = vmatprep.mubr.msk.f32.mxu1 %vm369_vm0, %v2547_v57 }
 0x15a   :  { %859 = vmatmul.mubr.f32.gmra.mxu0 %v2448_v9 }
 0x15b   :  { %1737 = vmatprep.mubr.msk.f32.mxu0 %vm369_vm0, %v2453_v4 }
 0x15c   :  { %728 = vmatmul.mubr.f32.gmra.mxu1 %v3589_v60 }
 0x15d   :  { %1726 = vmatprep.mubr.msk.f32.mxu1 %vm369_vm0, %v2568_v61 }
 0x15e   :  { %865 = vmatmul.mubr.f32.gmra.mxu0 %v2475_v13  ;;  %v3576_v13 = vmov 0.0  }
 0x15f   :  { %1738 = vmatprep.mubr.msk.f32.mxu0 %vm369_vm0, %v2480_v27 }
 0x160   :  { %734 = vmatmul.mubr.f32.gmra.mxu1 %v3590_v63 }
 0x161   :  { %1188 = vmatprep.mubr.f32.mxu1 %v3576_v13 }
 0x162   :  { %871 = vmatmul.mubr.f32.gmra.mxu0 %v2496_v16 }
 0x163   :  { %1739 = vmatprep.mubr.msk.f32.mxu0 %vm369_vm0, %v3587_v49 }
 0x166   :  { %877 = vmatmul.mubr.f32.gmra.mxu0 %v3588_v55 }
 0x167   :  { %1740 = vmatprep.mubr.msk.f32.mxu0 %vm369_vm0, %v2520_v43 }
 0x16a   :  { %883 = vmatmul.mubr.f32.gmra.mxu0 %v2542_v18 }
 0x16b   :  { %1741 = vmatprep.mubr.msk.f32.mxu0 %vm369_vm0, %v2547_v57 }
 0x16e   :  { %889 = vmatmul.mubr.f32.gmra.mxu0 %v3589_v60 }
 0x16f   :  { %1742 = vmatprep.mubr.msk.f32.mxu0 %vm369_vm0, %v2568_v61 }
 0x172   :  { %895 = vmatmul.mubr.f32.gmra.mxu0 %v3590_v63 }
 0x173   :  { %1426 = vmatprep.mubr.f32.mxu0 %v3576_v13 }
 0x194   :  { %v2775_v19 = vpop.f32.mrf.mxu0 }
 0x196   :  { %v2777_v24 = vpop.f32.mrf.mxu0 }
 0x198   :  { %v2779_v34 = vpop.f32.mrf.mxu0 }
 0x19a   :  { %v2781_v35 = vpop.f32.mrf.mxu0 }
 0x19c   :  { %v2783_v47 = vpop.f32.mrf.mxu0 }
 0x19e   :  { %v2785_v50 = vpop.f32.mrf.mxu0 }
 0x1a0   :  { %v2787_v0 = vpop.f32.mrf.mxu0 }
 0x1a2   :  { %v2789_v5 = vpop.f32.mrf.mxu0 }
 0x1a4   :  { %v2791_v30 = vpop.f32.mrf.mxu0 }
 0x1a6   :  { %v2793_v40 = vpop.f32.mrf.mxu0 }
 0x1a8   :  { %v2795_v26 = vpop.f32.mrf.mxu0 }
 0x1aa   :  { %v2797_v59 = vpop.f32.mrf.mxu0 }
 0x1ab   :  { %v932_v38 = vmax.f32 %v2797_v59, 0.0 }
 0x1ac   :  { %v2799_v41 = vpop.f32.mrf.mxu0 }
 0x1ae   :  { %v2801_v17 = vpop.f32.mrf.mxu0 }
 0x1b0   :  { %v2803_v36 = vpop.f32.mrf.mxu0 }
 0x1b2   :  { %v2805_v46 = vpop.f32.mrf.mxu0 }
 0x1b4   :  { %v2807_v9 = vpop.f32.mrf.mxu0 }
 0x1b6   :  { %v2809_v4 = vpop.f32.mrf.mxu0 }
 0x1b8   :  { %v538_v27 = vpop.f32.mrf.mxu0 }
 0x1b9   :  { %v955_v63 = vmax.f32 %v538_v27, 0.0  ;;  %v944_v27 = vmax.f32 %v2805_v46, 0.0 }
 0x1ba   :  { %v540_v16 = vpop.f32.mrf.mxu0 }
 0x1bb   :  { %v956_v55 = vmax.f32 %v540_v16, 0.0  ;;  %v1082_v16 = vmul.f32 %v2822_v52, %v955_v63  ;;  %v1071_v46 = vmul.f32 %v2825_v58, %v944_v27 }
 0x1bd   :  { %v544_v18 = vpop.f32.mrf.mxu0 }
 0x1be   :  { %v961_v3 = vmax.f32 %v544_v18, 0.0 }
 0x1bf   :  { %v546_v43 = vpop.f32.mrf.mxu0 }
 0x1c0   :  { %v962_v56 = vmax.f32 %v546_v43, 0.0  ;;  %v949_v43 = vmax.f32 %v2807_v9, 0.0  ;;  %v1088_v18 = vmul.f32 %v2822_v52, %v961_v3  ;;  %v938_v9 = vmax.f32 %v2801_v17, 0.0 }
 0x1c1   :  { %v550_v57 = vpop.f32.mrf.mxu0  ;;  %v926_v17 = vmax.f32 %v2793_v40, 0.0 }
 0x1c2   :  { %v967_v33 = vmax.f32 %v550_v57, 0.0  ;;  %v950_v57 = vmax.f32 %v2809_v4, 0.0  ;;  %v943_v4 = vmax.f32 %v2803_v36, 0.0  ;;  %v1076_v12 = vmul.f32 %v2822_v52, %v949_v43 }
 0x1c3   :  { %v552_v61 = vpop.f32.mrf.mxu0  ;;  %v931_v36 = vmax.f32 %v2795_v26, 0.0 }
 0x1c4   :  { %v968_v28 = vmax.f32 %v552_v61, 0.0  ;;  %v1094_v61 = vmul.f32 %v2822_v52, %v967_v33  ;;  %v1070_v20 = vmul.f32 %v2822_v52, %v943_v4 }
 0x1c5   :  { %v556_v29 = vpop.f32.mrf.mxu0  ;;  %v1058_v40 = vmul.f32 %v2822_v52, %v931_v36  ;;  %v2973_v36 = vld [vmem:[%s3553_s2 + $0x28] sm:$0xff] }
 0x1c6   :  { %v973_v37 = vmax.f32 %v556_v29, 0.0  ;;  %v1095_v60 = vmul.f32 %v2825_v58, %v968_v28  ;;  %v1089_v29 = vmul.f32 %v2825_v58, %v962_v56  ;;  %3604 = vst [vmem:[#allocation15_spill] sm:$0xff] %v2973_v36 }
 0x1c7   :  { %v558_v10 = vpop.f32.mrf.mxu0 }
 0x1c8   :  { %v974_v2 = vmax.f32 %v558_v10, 0.0  ;;  %v1100_v49 = vmul.f32 %v2822_v52, %v973_v37  ;;  %v1083_v10 = vmul.f32 %v2825_v58, %v956_v55 }
 0x1c9   :  { %v562_v7 = vpop.f32.mrf.mxu0 }
 0x1ca   :  { %v979_v62 = vmax.f32 %v562_v7, 0.0  ;;  %v1101_v39 = vmul.f32 %v2825_v58, %v974_v2  ;;  %v1077_v7 = vmul.f32 %v2825_v58, %v950_v57 }
 0x1cb   :  { %v564_v25 = vpop.f32.mrf.mxu0 }
 0x1cc   :  { %v980_v1 = vmax.f32 %v564_v25, 0.0  ;;  %v1106_v6 = vmul.f32 %v2822_v52, %v979_v62  ;;  %v913_v62 = vmax.f32 %v2783_v47, 0.0 }
 0x1cd   :  { %v568_v45 = vpop.f32.mrf.mxu0 }
 0x1ce   :  { %v985_v54 = vmax.f32 %v568_v45, 0.0  ;;  %v1107_v21 = vmul.f32 %v2825_v58, %v980_v1  ;;  %v937_v45 = vmax.f32 %v2799_v41, 0.0  ;;  %v925_v41 = vmax.f32 %v2791_v30, 0.0 }
 0x1cf   :  { %v570_v31 = vpop.f32.mrf.mxu0  ;;  %v914_v1 = vmax.f32 %v2785_v50, 0.0 }
 0x1d0   :  { %v986_v11 = vmax.f32 %v570_v31, 0.0  ;;  %v1112_v23 = vmul.f32 %v2822_v52, %v985_v54  ;;  %v1064_v59 = vmul.f32 %v2822_v52, %v937_v45  ;;  %v1059_v54 = vmul.f32 %v2825_v58, %v932_v38 }
 0x1d1   :  { %v574_v53 = vpop.f32.mrf.mxu0  ;;  %v1041_v37 = vmul.f32 %v2825_v58, %v914_v1  ;;  %v3003_v1 = vld [vmem:[%s3553_s2 + $0x38] sm:$0xff] }
 0x1d2   :  { %v991_v32 = vmax.f32 %v574_v53, 0.0  ;;  %v1113_v15 = vmul.f32 %v2825_v58, %v986_v11  ;;  %v1065_v53 = vmul.f32 %v2825_v58, %v938_v9  ;;  %3606 = vst [vmem:[#allocation17_spill] sm:$0xff] %v3003_v1 }
 0x1d3   :  { %v576_v44 = vpop.f32.mrf.mxu0 }
 0x1d4   :  { %v992_v42 = vmax.f32 %v576_v44, 0.0  ;;  %v1118_v22 = vmul.f32 %v2822_v52, %v991_v32  ;;  %v920_v32 = vmax.f32 %v2789_v5, 0.0  ;;  %v919_v44 = vmax.f32 %v2787_v0, 0.0 }
 0x1d5   :  { %v1052_v5 = vmul.f32 %v2822_v52, %v925_v41 }
 0x1d6   :  { %v1119_v8 = vmul.f32 %v2825_v58, %v992_v42  ;;  %v1053_v42 = vmul.f32 %v2825_v58, %v926_v17  ;;  %v1047_v2 = vmul.f32 %v2825_v58, %v920_v32  ;;  %v1046_v50 = vmul.f32 %v2822_v52, %v919_v44 }
 0x1d8   :  { %1124 = vmatprep.subr.mxu1 %v1119_v8  ;;  %v902_v8 = vmax.f32 %v2777_v24, 0.0 }
 0x1d9   :  { %1125 = vmatpush1.msra.mxu1 %v1118_v22  ;;  %v908_v22 = vmax.f32 %v2781_v35, 0.0  ;;  %v1040_v35 = vmul.f32 %v2822_v52, %v913_v62 }
 0x1da   :  { %1126 = vmatprep.subr.mxu1 %v1113_v15  ;;  %v907_v15 = vmax.f32 %v2779_v34, 0.0  ;;  %v1029_v24 = vmul.f32 %v2825_v58, %v902_v8 }
 0x1db   :  { %1127 = vmatpush1.msra.mxu1 %v1112_v23  ;;  %v901_v23 = vmax.f32 %v2775_v19, 0.0  ;;  %v1035_v28 = vmul.f32 %v2825_v58, %v908_v22  ;;  %v2898_v19 = vld [vmem:[%s3553_s2] sm:$0xff] }
 0x1dc   :  { %1128 = vmatprep.subr.mxu1 %v1107_v21  ;;  %v1034_v34 = vmul.f32 %v2822_v52, %v907_v15 }
 0x1dd   :  { %1129 = vmatpush1.msra.mxu1 %v1106_v6  ;;  %v1028_v6 = vmul.f32 %v2822_v52, %v901_v23  ;;  %v2913_v52 = vld [vmem:[%s3553_s2 + $0x8] sm:$0xff] }
 0x1de   :  { %1130 = vmatprep.subr.mxu1 %v1101_v39 }
 0x1df   :  { %1131 = vmatpush1.msra.mxu1 %v1100_v49 }
 0x1e0   :  { %1132 = vmatprep.subr.mxu1 %v1095_v60 }
 0x1e1   :  { %1133 = vmatpush1.msra.mxu1 %v1094_v61  ;;  %v2928_v61 = vld [vmem:[%s3553_s2 + $0x10] sm:$0xff] }
 0x1e2   :  { %1134 = vmatprep.subr.mxu1 %v1089_v29  ;;  %3596 = vst [vmem:[#allocation7_spill] sm:$0xff] %v2928_v61 }
 0x1e3   :  { %1135 = vmatpush1.msra.mxu1 %v1088_v18 }
 0x1e4   :  { %1136 = vmatprep.subr.mxu1 %v1083_v10  ;;  %v2848_v25 = vpop.f32.mrf.mxu1  ;;  %v2943_v10 = vld [vmem:[%s3553_s2 + $0x18] sm:$0xff] }
 0x1e5   :  { %1137 = vmatpush1.msra.mxu1 %v1082_v16  ;;  %3599 = vst [vmem:[#allocation10_spill] sm:$0xff] %v2943_v10 }
 0x1e6   :  { %1138 = vmatprep.subr.mxu1 %v1077_v7  ;;  %v2853_v31 = vpop.f32.mrf.mxu1 }
 0x1e7   :  { %1139 = vmatpush1.msra.mxu1 %v1076_v12  ;;  %v2958_v12 = vld [vmem:[%s3553_s2 + $0x20] sm:$0xff] }
 0x1e8   :  { %1140 = vmatprep.subr.mxu1 %v1071_v46  ;;  %v2859_v11 = vpop.f32.mrf.mxu1  ;;  %3602 = vst [vmem:[#allocation13_spill] sm:$0xff] %v2958_v12 }
 0x1e9   :  { %1141 = vmatpush1.msra.mxu1 %v1070_v20 }
 0x1ea   :  { %1142 = vmatprep.subr.mxu1 %v1065_v53  ;;  %v2865_v26 = vpop.f32.mrf.mxu1 }
 0x1eb   :  { %1143 = vmatpush1.msra.mxu1 %v1064_v59  ;;  %v2988_v59 = vld [vmem:[%s3553_s2 + $0x30] sm:$0xff] }
 0x1ec   :  { %1144 = vmatprep.subr.mxu1 %v1059_v54  ;;  %v2871_v30 = vpop.f32.mrf.mxu1  ;;  %3605 = vst [vmem:[#allocation16_spill] sm:$0xff] %v2988_v59 }
 0x1ed   :  { %1145 = vmatpush1.msra.mxu1 %v1058_v40 }
 0x1ee   :  { %1146 = vmatprep.subr.mxu1 %v1053_v42  ;;  %v2877_v0 = vpop.f32.mrf.mxu1 }
 0x1ef   :  { %1147 = vmatpush1.msra.mxu1 %v1052_v5 }
 0x1f0   :  { %1148 = vmatprep.subr.mxu1 %v1047_v2  ;;  %v2883_v47 = vpop.f32.mrf.mxu1  ;;  %v3014_v2 = vld [vmem:[%s3553_s2 + $0x40] sm:$0xff] }
 0x1f1   :  { %1149 = vmatpush1.msra.mxu1 %v1046_v50  ;;  %3607 = vst [vmem:[#allocation18_spill] sm:$0xff] %v3014_v2 }
 0x1f2   :  { %1150 = vmatprep.subr.mxu1 %v1041_v37  ;;  %v2888_v21 = vpop.f32.mrf.mxu1 }
 0x1f3   :  { %1151 = vmatpush1.msra.mxu1 %v1040_v35 }
 0x1f4   :  { %1152 = vmatprep.subr.mxu1 %v1035_v28  ;;  %v2892_v33 = vpop.f32.mrf.mxu1 }
 0x1f5   :  { %1153 = vmatpush1.msra.mxu1 %v1034_v34 }
 0x1f6   :  { %1154 = vmatprep.subr.mxu1 %v1029_v24  ;;  %v2900_v56 = vpop.f32.mrf.mxu1  ;;  %v2902_v39 = vpop.f32.mrf.mxu0 }
 0x1f7   :  { %3592 = vst [vmem:[#allocation3_spill] sm:$0xff] %v2902_v39  ;;  %1155 = vmatpush1.msra.mxu1 %v1028_v6 }
 0x1f8   :  { %1189 = vmatmul.mubr.f32.vlgmr.msra.gmra.mxu1 %v2898_v19  ;;  %v2905_v58 = vpop.f32.mrf.mxu1  ;;  %v2907_v3 = vpop.f32.mrf.mxu0 }
 0x1f9   :  { %3593 = vst [vmem:[#allocation4_spill] sm:$0xff] %v2907_v3  ;;  %1194 = vmatprep.mubr.f32.mxu1 %v3576_v13 }
 0x1fa   :  { %v2915_v49 = vpop.f32.mrf.mxu1  ;;  %v2917_v55 = vpop.f32.mrf.mxu0 }
 0x1fb   :  { %3594 = vst [vmem:[#allocation5_spill] sm:$0xff] %v2917_v55 }
 0x1fc   :  { %1195 = vmatmul.mubr.f32.gmra.mxu1 %v2913_v52  ;;  %v2920_v60 = vpop.f32.mrf.mxu1  ;;  %v2922_v63 = vpop.f32.mrf.mxu0 }
 0x1fd   :  { %3595 = vst [vmem:[#allocation6_spill] sm:$0xff] %v2922_v63  ;;  %1200 = vmatprep.mubr.f32.mxu1 %v3576_v13 }
 0x1fe   :  { %v2930_v57 = vpop.f32.mrf.mxu1  ;;  %v2932_v29 = vpop.f32.mrf.mxu0 }
 0x1ff   :  { %3597 = vst [vmem:[#allocation8_spill] sm:$0xff] %v2932_v29 }
 0x200   :  { %1201 = vmatmul.mubr.f32.gmra.mxu1 %v2928_v61  ;;  %v2935_v43 = vpop.f32.mrf.mxu1  ;;  %v2937_v18 = vpop.f32.mrf.mxu0 }
 0x201   :  { %3598 = vst [vmem:[#allocation9_spill] sm:$0xff] %v2937_v18  ;;  %1206 = vmatprep.mubr.f32.mxu1 %v3576_v13 }
 0x202   :  { %v2945_v16 = vpop.f32.mrf.mxu1  ;;  %v2947_v27 = vpop.f32.mrf.mxu0 }
 0x203   :  { %3600 = vst [vmem:[#allocation11_spill] sm:$0xff] %v2947_v27 }
 0x204   :  { %1207 = vmatmul.mubr.f32.gmra.mxu1 %v2943_v10  ;;  %v2950_v7 = vpop.f32.mrf.mxu1  ;;  %v2952_v4 = vpop.f32.mrf.mxu0 }
 0x205   :  { %3601 = vst [vmem:[#allocation12_spill] sm:$0xff] %v2952_v4  ;;  %1212 = vmatprep.mubr.f32.mxu1 %v3576_v13 }
 0x206   :  { %v2960_v9 = vpop.f32.mrf.mxu1  ;;  %v2962_v45 = vpop.f32.mrf.mxu0 }
 0x207   :  { %3603 = vst [vmem:[#allocation14_spill] sm:$0xff] %v2962_v45 }
 0x208   :  { %v2964_v38 = vpop.f32.mrf.mxu1  ;;  %v2966_v46 = vpop.f32.mrf.mxu0  ;;  %1213 = vmatmul.mubr.f32.gmra.mxu1 %v2958_v12 }
 0x209   :  { %1218 = vmatprep.mubr.f32.mxu1 %v3576_v13 }
 0x20a   :  { %v2975_v20 = vpop.f32.mrf.mxu1  ;;  %v2977_v17 = vpop.f32.mrf.mxu0 }
 0x20c   :  { %v2979_v53 = vpop.f32.mrf.mxu1  ;;  %v2981_v41 = vpop.f32.mrf.mxu0  ;;  %1219 = vmatmul.mubr.f32.gmra.mxu1 %v2973_v36 }
 0x20d   :  { %1224 = vmatprep.mubr.f32.mxu1 %v3576_v13 }
 0x20e   :  { %v2990_v32 = vpop.f32.mrf.mxu1  ;;  %v2992_v54 = vpop.f32.mrf.mxu0 }
 0x210   :  { %v2994_v44 = vpop.f32.mrf.mxu1  ;;  %v2996_v40 = vpop.f32.mrf.mxu0  ;;  %1225 = vmatmul.mubr.f32.gmra.mxu1 %v2988_v59 }
 0x211   :  { %1230 = vmatprep.mubr.f32.mxu1 %v3576_v13 }
 0x212   :  { %v713_v42 = vpop.f32.mrf.mxu1  ;;  %v3005_v62 = vpop.f32.mrf.mxu0 }
 0x214   :  { %v717_v5 = vpop.f32.mrf.mxu1  ;;  %v3007_v22 = vpop.f32.mrf.mxu0  ;;  %1231 = vmatmul.mubr.f32.gmra.mxu1 %v3003_v1  ;;  %v1008_v1 = vsub.s32 2, %v2812_v51 }
 0x215   :  { %1236 = vmatprep.mubr.f32.mxu1 %v3576_v13 }
 0x216   :  { %v719_v15 = vpop.f32.mrf.mxu1  ;;  %v3016_v50 = vpop.f32.mrf.mxu0  ;;  %v3038_v55 = vrot.slane %v2818_v48, %v1008_v1 }
 0x217   :  { %v976_v45 = vmax.f32 %v719_v15, 0.0 }
 0x218   :  { %v723_v8 = vpop.f32.mrf.mxu1  ;;  %v3018_v37 = vpop.f32.mrf.mxu0  ;;  %1237 = vmatmul.mubr.f32.gmra.mxu1 %v3014_v2 }
 0x219   :  { %1307 = vmatprep.mubr.f32.mxu1 %v3576_v13  ;;  %v3035_v13 = vrot.slane %v2818_v48, %v1012_v14  ;;  %v981_v27 = vmax.f32 %v723_v8, 0.0 }
 0x21a   :  { %v725_v23 = vpop.f32.mrf.mxu1  ;;  %v3022_v35 = vpop.f32.mrf.mxu0 }
 0x21b   :  { %v982_v61 = vmax.f32 %v725_v23, 0.0 }
 0x21c   :  { %v729_v28 = vpop.f32.mrf.mxu1  ;;  %v3024_v34 = vpop.f32.mrf.mxu0 }
 0x21d   :  { %v987_v63 = vmax.f32 %v729_v28, 0.0  ;;  %v970_v28 = vmax.f32 %v713_v42, 0.0  ;;  %v1109_v23 = vmul.f32 %v3035_v13, %v982_v61  ;;  %v958_v61 = vmax.f32 %v2975_v20, 0.0 }
 0x21e   :  { %v731_v24 = vpop.f32.mrf.mxu1  ;;  %v3026_v6 = vpop.f32.mrf.mxu0 }
 0x21f   :  { %v988_v10 = vmax.f32 %v731_v24, 0.0  ;;  %v975_v24 = vmax.f32 %v717_v5, 0.0 }
 0x220   :  { %v735_v59 = vpop.f32.mrf.mxu1  ;;  %v3030_v36 = vpop.f32.mrf.mxu0 }
 0x221   :  { %v993_v12 = vmax.f32 %v735_v59, 0.0  ;;  %v1115_v14 = vmul.f32 %v3035_v13, %v988_v10  ;;  %v964_v10 = vmax.f32 %v2990_v32, 0.0  ;;  %v1102_v5 = vmul.f32 %v3038_v55, %v975_v24 }
 0x222   :  { %v737_v2 = vpop.f32.mrf.mxu1  ;;  %v3032_v39 = vpop.f32.mrf.mxu0 }
 0x223   :  { %v994_v3 = vmax.f32 %v737_v2, 0.0  ;;  %v1120_v59 = vmul.f32 %v3038_v55, %v993_v12  ;;  %v1114_v2 = vmul.f32 %v3038_v55, %v987_v63  ;;  %v1108_v12 = vmul.f32 %v3038_v55, %v981_v27 }
 0x224   :  { %v3040_v29 = vpop.f32.mrf.mxu0  ;;  %v963_v63 = vmax.f32 %v2979_v53, 0.0  ;;  %v957_v27 = vmax.f32 %v2964_v38, 0.0  ;;  %v1091_v53 = vmul.f32 %v3035_v13, %v964_v10  ;;  %v946_v38 = vmax.f32 %v2945_v16, 0.0 }
 0x225   :  { %v1121_v18 = vmul.f32 %v3035_v13, %v994_v3  ;;  %v969_v3 = vmax.f32 %v2994_v44, 0.0  ;;  %v1097_v44 = vmul.f32 %v3035_v13, %v970_v28  ;;  %v1085_v28 = vmul.f32 %v3035_v13, %v958_v61 }
 0x226   :  { %v3044_v4 = vpop.f32.mrf.mxu0  ;;  %v1090_v20 = vmul.f32 %v3038_v55, %v963_v63  ;;  %v939_v16 = vmax.f32 %v2920_v60, 0.0 }
 0x227   :  { %1243 = vmatprep.subr.mxu1 %v1121_v18  ;;  %v1103_v18 = vmul.f32 %v3035_v13, %v976_v45  ;;  %v1096_v15 = vmul.f32 %v3038_v55, %v969_v3  ;;  %v952_v45 = vmax.f32 %v2960_v9, 0.0  ;;  %v945_v9 = vmax.f32 %v2935_v43, 0.0 }
 0x228   :  { %v3048_v1 = vpop.f32.mrf.mxu0  ;;  %1244 = vmatpush1.msra.mxu1 %v1120_v59  ;;  %v1016_v59 = vsub.s32 4, %v2812_v51 }
 0x229   :  { %1245 = vmatprep.subr.mxu1 %v1115_v14  ;;  %v951_v14 = vmax.f32 %v2950_v7, 0.0  ;;  %v1079_v7 = vmul.f32 %v3035_v13, %v952_v45  ;;  %v933_v45 = vmax.f32 %v2905_v58, 0.0  ;;  %v1072_v60 = vmul.f32 %v3038_v55, %v945_v9 }
 0x22a   :  { %v3053_v8 = vpop.f32.mrf.mxu0  ;;  %1246 = vmatpush1.msra.mxu1 %v1114_v2  ;;  %v1020_v2 = vsub.s32 5, %v2812_v51  ;;  %v3078_v51 = vrot.slane %v2818_v48, %v1016_v59  ;;  %v1066_v58 = vmul.f32 %v3038_v55, %v939_v16  ;;  %v972_v9 = vmax.f32 %v3040_v29, 0.0 }
 0x22b   :  { %1247 = vmatprep.subr.mxu1 %v1109_v23  ;;  %v1084_v23 = vmul.f32 %v3038_v55, %v957_v27  ;;  %v1078_v63 = vmul.f32 %v3038_v55, %v951_v14  ;;  %v983_v14 = vmax.f32 %v3053_v8, 0.0  ;;  %v916_v8 = vmax.f32 %v2877_v0, 0.0 }
 0x22c   :  { %v3059_v42 = vpop.f32.mrf.mxu0  ;;  %1248 = vmatpush1.msra.mxu1 %v1108_v12  ;;  %v940_v12 = vmax.f32 %v2930_v57, 0.0  ;;  %v3083_v61 = vrot.slane %v2818_v48, %v1020_v2  ;;  %v934_v57 = vmax.f32 %v2915_v49, 0.0  ;;  %v978_v2 = vmax.f32 %v3048_v1, 0.0 }
 0x22d   :  { %1249 = vmatprep.subr.mxu1 %v1103_v18  ;;  %v984_v48 = vmax.f32 %v3059_v42, 0.0  ;;  %v910_v0 = vmax.f32 %v2865_v26, 0.0  ;;  %v904_v26 = vmax.f32 %v2853_v31, 0.0  ;;  %v960_v16 = vmax.f32 %v3024_v34, 0.0 }
 0x22e   :  { %v890_v32 = vpop.f32.mrf.mxu0  ;;  %1250 = vmatpush1.msra.mxu1 %v1102_v5  ;;  %v1061_v42 = vmul.f32 %v3035_v13, %v934_v57  ;;  %v954_v57 = vmax.f32 %v3018_v37, 0.0  ;;  %v948_v37 = vmax.f32 %v3007_v22, 0.0 }
 0x22f   :  { %1251 = vmatprep.subr.mxu1 %v1097_v44  ;;  %v989_v5 = vmax.f32 %v890_v32, 0.0  ;;  %v1073_v44 = vmul.f32 %v3035_v13, %v946_v38  ;;  %v1067_v32 = vmul.f32 %v3035_v13, %v940_v12  ;;  %v921_v38 = vmax.f32 %v2883_v47, 0.0 }
 0x230   :  { %v892_v24 = vpop.f32.mrf.mxu0  ;;  %1252 = vmatpush1.msra.mxu1 %v1096_v15  ;;  %v928_v15 = vmax.f32 %v2900_v56, 0.0  ;;  %v927_v56 = vmax.f32 %v2892_v33, 0.0  ;;  %v1060_v33 = vmul.f32 %v3038_v55, %v933_v45  ;;  %v3119_v1 = vmul.f32 %v3083_v61, %v984_v48 }
 0x231   :  { %1253 = vmatprep.subr.mxu1 %v1091_v53  ;;  %v990_v10 = vmax.f32 %v892_v24, 0.0  ;;  %v922_v24 = vmax.f32 %v2888_v21, 0.0  ;;  %v915_v47 = vmax.f32 %v2871_v30, 0.0  ;;  %v966_v12 = vmax.f32 %v3030_v36, 0.0 }
 0x232   :  { %v896_v3 = vpop.f32.mrf.mxu0  ;;  %1254 = vmatpush1.msra.mxu1 %v1090_v20  ;;  %v3105_v20 = vmul.f32 %v3078_v51, %v989_v5  ;;  %v1055_v21 = vmul.f32 %v3035_v13, %v928_v15  ;;  %v909_v30 = vmax.f32 %v2859_v11, 0.0  ;;  %v1043_v36 = vmul.f32 %v3035_v13, %v916_v8  ;;  %v3613_v8 = vld [vmem:[#allocation7_spill] sm:$0xff] }
 0x233   :  { %v995_v18 = vmax.f32 %v896_v3, 0.0  ;;  %1255 = vmatprep.subr.mxu1 %v1085_v28  ;;  %v3096_v49 = vmul.f32 %v3083_v61, %v990_v10  ;;  %v977_v28 = vmax.f32 %v3044_v4, 0.0  ;;  %v971_v4 = vmax.f32 %v3032_v39, 0.0 }
 0x234   :  { %v898_v43 = vpop.f32.mrf.mxu0  ;;  %1256 = vmatpush1.msra.mxu1 %v1084_v23  ;;  %v1054_v23 = vmul.f32 %v3038_v55, %v927_v56  ;;  %v3126_v3 = vmul.f32 %v3078_v51, %v983_v14  ;;  %v1049_v29 = vmul.f32 %v3035_v13, %v922_v24  ;;  %v1048_v39 = vmul.f32 %v3038_v55, %v921_v38  ;;  %v3610_v14 = vld [vmem:[#allocation12_spill] sm:$0xff]  ;;  %v3612_v38 = vld [vmem:[#allocation9_spill] sm:$0xff] }
 0x235   :  { %v996_v27 = vmax.f32 %v898_v43, 0.0  ;;  %1257 = vmatprep.subr.mxu1 %v1079_v7  ;;  %v3091_v53 = vmul.f32 %v3078_v51, %v995_v18  ;;  %v3133_v7 = vmul.f32 %v3083_v61, %v978_v2  ;;  %v965_v10 = vmax.f32 %v3026_v6, 0.0 }
 0x236   :  { %1258 = vmatpush1.msra.mxu1 %v1078_v63  ;;  %v3140_v18 = vmul.f32 %v3078_v51, %v977_v28  ;;  %v3147_v63 = vmul.f32 %v3083_v61, %v972_v9  ;;  %v903_v11 = vmax.f32 %v2848_v25, 0.0  ;;  %v1042_v6 = vmul.f32 %v3038_v55, %v915_v47  ;;  %v3615_v47 = vld [vmem:[#allocation6_spill] sm:$0xff] }
 0x237   :  { %v3099_v59 = vmul.f32 %v3083_v61, %v996_v27  ;;  %1259 = vmatprep.subr.mxu1 %v1073_v44  ;;  %v959_v5 = vmax.f32 %v3022_v35, 0.0  ;;  %v3154_v43 = vmul.f32 %v3078_v51, %v971_v4  ;;  %v1037_v31 = vmul.f32 %v3035_v13, %v910_v0 }
 0x238   :  { %1260 = vmatpush1.msra.mxu1 %v1072_v60  ;;  %v3159_v34 = vmul.f32 %v3083_v61, %v966_v12  ;;  %v1036_v25 = vmul.f32 %v3038_v55, %v909_v30  ;;  %v3165_v35 = vmul.f32 %v3078_v51, %v965_v10  ;;  %v1031_v44 = vmul.f32 %v3035_v13, %v904_v26  ;;  %v3617_v12 = vld [vmem:[#allocation4_spill] sm:$0xff]  ;;  %v3619_v10 = vld [vmem:[#allocation3_spill] sm:$0xff] }
 0x239   :  { %1261 = vmatprep.subr.mxu1 %v1067_v32  ;;  %1362 = vmatprep.subr.mxu0 %v3099_v59  ;;  %v953_v27 = vmax.f32 %v3016_v50, 0.0  ;;  %v3171_v15 = vmul.f32 %v3083_v61, %v960_v16  ;;  %v1030_v45 = vmul.f32 %v3038_v55, %v903_v11  ;;  %v3177_v60 = vmul.f32 %v3078_v51, %v959_v5  ;;  %v3620_v11 = vld [vmem:[#allocation13_spill] sm:$0xff] }
 0x23a   :  { %1262 = vmatpush1.msra.mxu1 %v1066_v58  ;;  %1363 = vmatpush1.msra.mxu0 %v3091_v53  ;;  %v947_v13 = vmax.f32 %v3005_v62, 0.0  ;;  %v3183_v50 = vmul.f32 %v3083_v61, %v954_v57  ;;  %v942_v55 = vmax.f32 %v2996_v40, 0.0  ;;  %v941_v62 = vmax.f32 %v2992_v54, 0.0 }
 0x23b   :  { %1263 = vmatprep.subr.mxu1 %v1061_v42  ;;  %1364 = vmatprep.subr.mxu0 %v3096_v49  ;;  %v3188_v22 = vmul.f32 %v3078_v51, %v953_v27  ;;  %v3194_v32 = vmul.f32 %v3083_v61, %v948_v37  ;;  %v936_v48 = vmax.f32 %v2981_v41, 0.0  ;;  %v3608_v54 = vmov 0.0  }
 0x23c   :  { %1264 = vmatpush1.msra.mxu1 %v1060_v33  ;;  %1365 = vmatpush1.msra.mxu0 %v3105_v20  ;;  %v3200_v40 = vmul.f32 %v3078_v51, %v947_v13  ;;  %v1069_v56 = vmul.f32 %v3083_v61, %v942_v55  ;;  %v930_v41 = vmax.f32 %v2966_v46, 0.0  ;;  %v924_v24 = vmax.f32 %v3610_v14, 0.0  ;;  %v3611_v46 = vld [vmem:[#allocation11_spill] sm:$0xff] }
 0x23d   :  { %1265 = vmatprep.subr.mxu1 %v1055_v21  ;;  %1366 = vmatprep.subr.mxu0 %v3119_v1  ;;  %v1063_v58 = vmul.f32 %v3083_v61, %v936_v48  ;;  %v923_v42 = vmax.f32 %v3611_v46, 0.0  ;;  %v918_v33 = vmax.f32 %v3612_v38, 0.0  ;;  %v3614_v21 = vld [vmem:[#allocation8_spill] sm:$0xff] }
 0x23e   :  { %1266 = vmatpush1.msra.mxu1 %v1054_v23  ;;  %1367 = vmatpush1.msra.mxu0 %v3126_v3  ;;  %v1057_v2 = vmul.f32 %v3083_v61, %v930_v41  ;;  %v917_v9 = vmax.f32 %v3614_v21, 0.0  ;;  %v912_v23 = vmax.f32 %v3615_v47, 0.0 }
 0x23f   :  { %1267 = vmatprep.subr.mxu1 %v1049_v29  ;;  %1368 = vmatprep.subr.mxu0 %v3133_v7  ;;  %v1050_v4 = vmul.f32 %v3078_v51, %v923_v42  ;;  %v1045_v29 = vmul.f32 %v3083_v61, %v918_v33 }
 0x240   :  { %1268 = vmatpush1.msra.mxu1 %v1048_v39  ;;  %1369 = vmatpush1.msra.mxu0 %v3140_v18  ;;  %v1044_v30 = vmul.f32 %v3078_v51, %v917_v9  ;;  %v3618_v39 = vld [vmem:[#allocation10_spill] sm:$0xff]  ;;  %v1039_v26 = vmul.f32 %v3083_v61, %v912_v23 }
 0x241   :  { %1269 = vmatprep.subr.mxu1 %v1043_v36  ;;  %1370 = vmatprep.subr.mxu0 %v3147_v63 }
 0x242   :  { %1270 = vmatpush1.msra.mxu1 %v1042_v6  ;;  %1371 = vmatpush1.msra.mxu0 %v3154_v43  ;;  %v3621_v6 = vld [vmem:[#allocation15_spill] sm:$0xff] }
 0x243   :  { %1271 = vmatprep.subr.mxu1 %v1037_v31  ;;  %1372 = vmatprep.subr.mxu0 %v3159_v34 }
 0x244   :  { %1272 = vmatpush1.msra.mxu1 %v1036_v25  ;;  %1373 = vmatpush1.msra.mxu0 %v3165_v35 }
 0x245   :  { %1273 = vmatprep.subr.mxu1 %v1031_v44  ;;  %1374 = vmatprep.subr.mxu0 %v3171_v15 }
 0x246   :  { %1274 = vmatpush1.msra.mxu1 %v1030_v45  ;;  %1375 = vmatpush1.msra.mxu0 %v3177_v60 }
 0x247   :  { %1308 = vmatmul.mubr.f32.vlgmr.msra.gmra.mxu1 %v2898_v19  ;;  %1743 = vmatprep.subr.mxu1 %v3099_v59  ;;  %v935_v59 = vmax.f32 %v2977_v17, 0.0 }
 0x248   :  { %1376 = vmatprep.subr.mxu0 %v3183_v50  ;;  %1759 = vmatpush1.msra.mxu1 %v3091_v53  ;;  %v1068_v53 = vmul.f32 %v3078_v51, %v941_v62 }
 0x249   :  { %1377 = vmatpush1.msra.mxu0 %v3188_v22  ;;  %1744 = vmatprep.subr.mxu1 %v3096_v49  ;;  %v3609_v49 = vld [vmem:[#allocation14_spill] sm:$0xff] }
 0x24a   :  { %1378 = vmatprep.subr.mxu0 %v3194_v32  ;;  %1313 = vmatprep.mubr.f32.mxu1 %v3608_v54  ;;  %v929_v17 = vmax.f32 %v3609_v49, 0.0 }
 0x24b   :  { %1760 = vmatpush1.msra.mxu1 %v3105_v20  ;;  %1379 = vmatpush1.msra.mxu0 %v3200_v40  ;;  %v1062_v20 = vmul.f32 %v3078_v51, %v935_v59 }
 0x24c   :  { %1314 = vmatmul.mubr.f32.gmra.mxu1 %v2913_v52  ;;  %1745 = vmatprep.subr.mxu1 %v3119_v1  ;;  %v1056_v28 = vmul.f32 %v3078_v51, %v929_v17  ;;  %v1051_v1 = vmul.f32 %v3083_v61, %v924_v24 }
 0x24d   :  { %1380 = vmatprep.subr.mxu0 %v1069_v56  ;;  %1761 = vmatpush1.msra.mxu1 %v3126_v3  ;;  %v3616_v3 = vld [vmem:[#allocation5_spill] sm:$0xff] }
 0x24e   :  { %1381 = vmatpush1.msra.mxu0 %v1068_v53  ;;  %1746 = vmatprep.subr.mxu1 %v3133_v7  ;;  %v911_v0 = vmax.f32 %v3616_v3, 0.0  ;;  %v906_v7 = vmax.f32 %v3617_v12, 0.0 }
 0x24f   :  { %1382 = vmatprep.subr.mxu0 %v1063_v58  ;;  %1319 = vmatprep.mubr.f32.mxu1 %v3608_v54 }
 0x250   :  { %1762 = vmatpush1.msra.mxu1 %v3140_v18  ;;  %1383 = vmatpush1.msra.mxu0 %v1062_v20  ;;  %v905_v18 = vmax.f32 %v3619_v10, 0.0  ;;  %v1038_v36 = vmul.f32 %v3078_v51, %v911_v0  ;;  %v1033_v16 = vmul.f32 %v3083_v61, %v906_v7  ;;  %v3623_v61 = vld [vmem:[#allocation17_spill] sm:$0xff] }
 0x251   :  { %1320 = vmatmul.mubr.f32.gmra.mxu1 %v3613_v8  ;;  %1747 = vmatprep.subr.mxu1 %v3147_v63 }
 0x252   :  { %1384 = vmatprep.subr.mxu0 %v1057_v2  ;;  %1763 = vmatpush1.msra.mxu1 %v3154_v43  ;;  %v1032_v63 = vmul.f32 %v3078_v51, %v905_v18  ;;  %v3622_v51 = vld [vmem:[#allocation16_spill] sm:$0xff] }
 0x253   :  { %1385 = vmatpush1.msra.mxu0 %v1056_v28  ;;  %1748 = vmatprep.subr.mxu1 %v3159_v34 }
 0x254   :  { %1386 = vmatprep.subr.mxu0 %v1051_v1  ;;  %1325 = vmatprep.mubr.f32.mxu1 %v3608_v54 }
 0x255   :  { %1764 = vmatpush1.msra.mxu1 %v3165_v35  ;;  %1387 = vmatpush1.msra.mxu0 %v1050_v4 }
 0x256   :  { %1326 = vmatmul.mubr.f32.gmra.mxu1 %v3618_v39  ;;  %1749 = vmatprep.subr.mxu1 %v3171_v15 }
 0x257   :  { %1388 = vmatprep.subr.mxu0 %v1045_v29  ;;  %1765 = vmatpush1.msra.mxu1 %v3177_v60 }
 0x258   :  { %1389 = vmatpush1.msra.mxu0 %v1044_v30  ;;  %1750 = vmatprep.subr.mxu1 %v3183_v50 }
 0x259   :  { %1390 = vmatprep.subr.mxu0 %v1039_v26  ;;  %1331 = vmatprep.mubr.f32.mxu1 %v3608_v54 }
 0x25a   :  { %1766 = vmatpush1.msra.mxu1 %v3188_v22  ;;  %1391 = vmatpush1.msra.mxu0 %v1038_v36 }
 0x25b   :  { %1332 = vmatmul.mubr.f32.gmra.mxu1 %v3620_v11  ;;  %1751 = vmatprep.subr.mxu1 %v3194_v32 }
 0x25c   :  { %1392 = vmatprep.subr.mxu0 %v1033_v16  ;;  %1767 = vmatpush1.msra.mxu1 %v3200_v40 }
 0x25d   :  { %1393 = vmatpush1.msra.mxu0 %v1032_v63  ;;  %1752 = vmatprep.subr.mxu1 %v1069_v56 }
 0x25e   :  { %1337 = vmatprep.mubr.f32.mxu1 %v3608_v54  ;;  %1768 = vmatpush1.msra.mxu1 %v1068_v53 }
 0x25f   :  { %1338 = vmatmul.mubr.f32.gmra.mxu1 %v3621_v6  ;;  %1753 = vmatprep.subr.mxu1 %v1063_v58 }
 0x260   :  { %1769 = vmatpush1.msra.mxu1 %v1062_v20  ;;  %1343 = vmatprep.mubr.f32.mxu1 %v3608_v54 }
 0x261   :  { %1754 = vmatprep.subr.mxu1 %v1057_v2  ;;  %1427 = vmatmul.mubr.f32.vlgmr.msra.gmra.mxu0 %v2898_v19  ;;  %v3624_v19 = vld [vmem:[#allocation18_spill] sm:$0xff] }
 0x262   :  { %1770 = vmatpush1.msra.mxu1 %v1056_v28  ;;  %1432 = vmatprep.mubr.f32.mxu0 %v3608_v54 }
 0x263   :  { %1344 = vmatmul.mubr.f32.gmra.mxu1 %v3622_v51  ;;  %1755 = vmatprep.subr.mxu1 %v1051_v1 }
 0x264   :  { %1771 = vmatpush1.msra.mxu1 %v1050_v4  ;;  %1349 = vmatprep.mubr.f32.mxu1 %v3608_v54 }
 0x265   :  { %1756 = vmatprep.subr.mxu1 %v1045_v29  ;;  %1433 = vmatmul.mubr.f32.gmra.mxu0 %v2913_v52 }
 0x266   :  { %1772 = vmatpush1.msra.mxu1 %v1044_v30  ;;  %1438 = vmatprep.mubr.f32.mxu0 %v3608_v54 }
 0x267   :  { %1757 = vmatprep.subr.mxu1 %v1039_v26  ;;  %1350 = vmatmul.mubr.f32.gmra.mxu1 %v3623_v61 }
 0x268   :  { %1773 = vmatpush1.msra.mxu1 %v1038_v36  ;;  %1355 = vmatprep.mubr.f32.mxu1 %v3608_v54 }
 0x269   :  { %1758 = vmatprep.subr.mxu1 %v1033_v16  ;;  %1439 = vmatmul.mubr.f32.gmra.mxu0 %v3613_v8 }
 0x26a   :  { %1774 = vmatpush1.msra.mxu1 %v1032_v63  ;;  %1444 = vmatprep.mubr.f32.mxu0 %v3608_v54 }
 0x26b   :  { %1356 = vmatmul.mubr.f32.gmra.mxu1 %v3624_v19 }
 0x26c   :  { %1462 = vmatprep.mubr.f32.mxu1 %v3608_v54 }
 0x26d   :  { %1445 = vmatmul.mubr.f32.gmra.mxu0 %v3618_v39 }
 0x26e   :  { %1450 = vmatprep.mubr.f32.mxu0 %v3608_v54 }
 0x26f   :  { %1463 = vmatmul.mubr.f32.vlgmr.msra.gmra.mxu1 %v3622_v51 }
 0x270   :  { %1468 = vmatprep.mubr.f32.mxu1 %v3608_v54 }
 0x271   :  { %1451 = vmatmul.mubr.f32.gmra.mxu0 %v3620_v11 }
 0x272   :  { %1456 = vmatprep.mubr.f32.mxu0 %v3608_v54 }
 0x273   :  { %1469 = vmatmul.mubr.f32.gmra.mxu1 %v3623_v61 }
 0x274   :  { %1474 = vmatprep.mubr.f32.mxu1 %v3608_v54 }
 0x275   :  { %1457 = vmatmul.mubr.f32.gmra.mxu0 %v3621_v6 }
 0x277   :  { %1475 = vmatmul.mubr.f32.gmra.mxu1 %v3624_v19 }
 0x2b8   :  { %v1190_v52 = vpop.f32.mrf.mxu1 }
 0x2b9   :  { %1481 = vrot.lane.b32.xlu0 %v1190_v52, %s1790_s11 }
 0x2ba   :  { %v1192_v5 = vpop.f32.mrf.mxu1 }
 0x2bb   :  { %1483 = vrot.lane.b32.xlu1 %v1192_v5, %s1790_s11 }
 0x2bc   :  { %v1196_v43 = vpop.f32.mrf.mxu1 }
 0x2bd   :  { %1505 = vrot.lane.b32.xlu0 %v1196_v43, %s1789_s10 }
 0x2be   :  { %v1198_v31 = vpop.f32.mrf.mxu1 }
 0x2bf   :  { %1507 = vrot.lane.b32.xlu1 %v1198_v31, %s1789_s10 }
 0x2c0   :  { %v1202_v34 = vpop.f32.mrf.mxu1 }
 0x2c1   :  { %1529 = vrot.lane.b32.xlu0 %v1202_v34, %s1788_s9 }
 0x2c2   :  { %v1204_v25 = vpop.f32.mrf.mxu1 }
 0x2c3   :  { %1531 = vrot.lane.b32.xlu1 %v1204_v25, %s1788_s9 }
 0x2c4   :  { %v1208_v57 = vpop.f32.mrf.mxu1 }
 0x2c5   :  { %1553 = vrot.lane.b32.xlu0 %v1208_v57, %s1787_s30 }
 0x2c6   :  { %v1210_v35 = vpop.f32.mrf.mxu1 }
 0x2c7   :  { %1555 = vrot.lane.b32.xlu1 %v1210_v35, %s1787_s30 }
 0x2c8   :  { %v3287_v44 = vpop.f32.mrf.mxu1 }
 0x2ca   :  { %v3289_v27 = vpop.f32.mrf.mxu1 }
 0x2cc   :  { %v1220_v15 = vpop.f32.mrf.mxu1 }
 0x2cd   :  { %1583 = vrot.lane.b32.xlu0 %v1220_v15, %s1786_s29 }
 0x2ce   :  { %v1222_v45 = vpop.f32.mrf.mxu1 }
 0x2cf   :  { %1585 = vrot.lane.b32.xlu1 %v1222_v45, %s1786_s29 }
 0x2d0   :  { %v1226_v37 = vpop.f32.mrf.mxu1 }
 0x2d1   :  { %1607 = vrot.lane.b32.xlu0 %v1226_v37, %s1785_s28 }
 0x2d2   :  { %v1228_v60 = vpop.f32.mrf.mxu1 }
 0x2d3   :  { %1609 = vrot.lane.b32.xlu1 %v1228_v60, %s1785_s28 }
 0x2d4   :  { %v1232_v13 = vpop.f32.mrf.mxu1 }
 0x2d5   :  { %1631 = vrot.lane.b32.xlu0 %v1232_v13, %s1784_s19 }
 0x2d6   :  { %v1234_v50 = vpop.f32.mrf.mxu1 }
 0x2d7   :  { %1633 = vrot.lane.b32.xlu1 %v1234_v50, %s1784_s19 }
 0x2d8   :  { %v1238_v55 = vpop.f32.mrf.mxu1 }
 0x2d9   :  { %1655 = vrot.lane.b32.xlu0 %v1238_v55, %s1791_s14 }
 0x2da   :  { %v1240_v22 = vpop.f32.mrf.mxu1 }
 0x2db   :  { %1657 = vrot.lane.b32.xlu1 %v1240_v22, %s1791_s14 }
 0x307   :  { %v1309_v62 = vpop.f32.mrf.mxu1 }
 0x308   :  { %1485 = vrot.lane.b32.xlu0 %v1309_v62, %s1790_s11 }
 0x309   :  { %v1311_v32 = vpop.f32.mrf.mxu1 }
 0x30a   :  { %1487 = vrot.lane.b32.xlu1 %v1311_v32, %s1790_s11 }
 0x30c   :  { %v1315_v48 = vpop.f32.mrf.mxu1 }
 0x30d   :  { %1509 = vrot.lane.b32.xlu0 %v1315_v48, %s1789_s10 }
 0x30e   :  { %v1317_v40 = vpop.f32.mrf.mxu1 }
 0x30f   :  { %1511 = vrot.lane.b32.xlu1 %v1317_v40, %s1789_s10 }
 0x311   :  { %v1321_v59 = vpop.f32.mrf.mxu1 }
 0x312   :  { %1533 = vrot.lane.b32.xlu0 %v1321_v59, %s1788_s9 }
 0x313   :  { %v1323_v54 = vpop.f32.mrf.mxu1 }
 0x314   :  { %1535 = vrot.lane.b32.xlu1 %v1323_v54, %s1788_s9 }
 0x316   :  { %v1327_v56 = vpop.f32.mrf.mxu1 }
 0x317   :  { %1557 = vrot.lane.b32.xlu0 %v1327_v56, %s1787_s30 }
 0x318   :  { %v1329_v41 = vpop.f32.mrf.mxu1 }
 0x319   :  { %1559 = vrot.lane.b32.xlu1 %v1329_v41, %s1787_s30 }
 0x31b   :  { %v3307_v53 = vpop.f32.mrf.mxu1 }
 0x31d   :  { %v3309_v49 = vpop.f32.mrf.mxu1 }
 0x31f   :  { %v1339_v17 = vpop.f32.mrf.mxu1 }
 0x320   :  { %1587 = vrot.lane.b32.xlu0 %v1339_v17, %s1786_s29 }
 0x321   :  { %v1341_v58 = vpop.f32.mrf.mxu1  ;;  %v1428_v14 = vpop.f32.mrf.mxu0 }
 0x322   :  { %1589 = vrot.lane.b32.xlu1 %v1341_v58, %s1786_s29 }
 0x323   :  { %v1345_v24 = vpop.f32.mrf.mxu1  ;;  %v1430_v20 = vpop.f32.mrf.mxu0 }
 0x324   :  { %1611 = vrot.lane.b32.xlu0 %v1345_v24, %s1785_s28 }
 0x325   :  { %v1347_v46 = vpop.f32.mrf.mxu1  ;;  %v1434_v42 = vpop.f32.mrf.mxu0 }
 0x326   :  { %1613 = vrot.lane.b32.xlu1 %v1347_v46, %s1785_s28 }
 0x327   :  { %v1351_v2 = vpop.f32.mrf.mxu1  ;;  %v1436_v38 = vpop.f32.mrf.mxu0 }
 0x328   :  { %1489 = vrot.lane.b32.xlu0 %v1428_v14, %s1790_s11 }
 0x329   :  { %v1353_v33 = vpop.f32.mrf.mxu1  ;;  %v1440_v8 = vpop.f32.mrf.mxu0 }
 0x32a   :  { %1491 = vrot.lane.b32.xlu1 %v1430_v20, %s1790_s11 }
 0x32b   :  { %v3317_v28 = vpop.permute.xlu0 %1481  ;;  %v1357_v21 = vpop.f32.mrf.mxu1 }
 0x32c   :  { %1635 = vrot.lane.b32.xlu0 %v1351_v2, %s1784_s19  ;;  %v1442_v47 = vpop.f32.mrf.mxu0 }
 0x32d   :  { %v3320_v9 = vpop.permute.xlu1 %1483  ;;  %v1359_v23 = vpop.f32.mrf.mxu1 }
 0x32e   :  { %1637 = vrot.lane.b32.xlu1 %v1353_v33, %s1784_s19  ;;  %v1446_v3 = vpop.f32.mrf.mxu0  ;;  %v1497_v60 = vsel %vm97_vm7, %v3317_v28, %v3320_v9 }
 0x32f   :  { %v3323_v1 = vpop.permute.xlu0 %1505  ;;  %v1464_v29 = vpop.f32.mrf.mxu1 }
 0x330   :  { %1513 = vrot.lane.b32.xlu0 %v1434_v42, %s1789_s10  ;;  %v1448_v7 = vpop.f32.mrf.mxu0 }
 0x331   :  { %v3326_v4 = vpop.permute.xlu1 %1507  ;;  %v1466_v39 = vpop.f32.mrf.mxu1 }
 0x332   :  { %1515 = vrot.lane.b32.xlu1 %v1436_v38, %s1789_s10  ;;  %v3340_v18 = vpop.f32.mrf.mxu0  ;;  %v1521_v13 = vsel %vm134_vm6, %v3323_v1, %v3326_v4 }
 0x333   :  { %v3329_v0 = vpop.permute.xlu0 %1529  ;;  %v1470_v16 = vpop.f32.mrf.mxu1  ;;  %v1524_v55 = vadd.f32 %v1521_v13, %v1497_v60 }
 0x334   :  { %1537 = vrot.lane.b32.xlu0 %v1440_v8, %s1788_s9  ;;  %v3348_v63 = vpop.f32.mrf.mxu0 }
 0x335   :  { %v3332_v12 = vpop.permute.xlu1 %1531  ;;  %v1472_v11 = vpop.f32.mrf.mxu1 }
 0x336   :  { %1539 = vrot.lane.b32.xlu1 %v1442_v47, %s1788_s9  ;;  %v1458_v6 = vpop.f32.mrf.mxu0  ;;  %v1545_v22 = vsel %vm171_vm5, %v3329_v0, %v3332_v12 }
 0x337   :  { %v3335_v30 = vpop.permute.xlu0 %1553  ;;  %v1476_v61 = vpop.f32.mrf.mxu1  ;;  %v1548_v32 = vadd.f32 %v1545_v22, %v1524_v55 }
 0x338   :  { %1615 = vrot.lane.b32.xlu0 %v1464_v29, %s1785_s28  ;;  %v1460_v51 = vpop.f32.mrf.mxu0 }
 0x339   :  { %v3338_v10 = vpop.permute.xlu1 %1555  ;;  %v1478_v19 = vpop.f32.mrf.mxu1 }
 0x33a   :  { %1617 = vrot.lane.b32.xlu1 %v1466_v39, %s1785_s28  ;;  %v1569_v36 = vsel %vm208_vm4, %v3335_v30, %v3338_v10 }
 0x33b   :  { %v1572_v40 = vadd.f32 %v1569_v36, %v1548_v32 }
 0x33c   :  { %1561 = vrot.lane.b32.xlu0 %v1446_v3, %s1787_s30 }
 0x33d   :  { %v1578_v41 = vadd.f32 %v1572_v40, %v3289_v27 }
 0x33e   :  { %1563 = vrot.lane.b32.xlu1 %v1448_v7, %s1787_s30 }
 0x33f   :  { %v3359_v52 = vpop.permute.xlu0 %1583 }
 0x340   :  { %1639 = vrot.lane.b32.xlu0 %v1470_v16, %s1784_s19 }
 0x341   :  { %v3361_v5 = vpop.permute.xlu1 %1585 }
 0x342   :  { %1641 = vrot.lane.b32.xlu1 %v1472_v11, %s1784_s19 }
 0x343   :  { %v3363_v43 = vpop.permute.xlu0 %1607 }
 0x344   :  { %1591 = vrot.lane.b32.xlu0 %v1458_v6, %s1786_s29 }
 0x345   :  { %v3365_v31 = vpop.permute.xlu1 %1609 }
 0x346   :  { %1593 = vrot.lane.b32.xlu1 %v1460_v51, %s1786_s29 }
 0x347   :  { %v3367_v34 = vpop.permute.xlu0 %1631 }
 0x348   :  { %1659 = vrot.lane.b32.xlu0 %v1357_v21, %s1791_s14 }
 0x349   :  { %v3369_v25 = vpop.permute.xlu1 %1633 }
 0x34a   :  { %1661 = vrot.lane.b32.xlu1 %v1359_v23, %s1791_s14 }
 0x34b   :  { %v3371_v57 = vpop.permute.xlu0 %1655 }
 0x34c   :  { %1663 = vrot.lane.b32.xlu0 %v1476_v61, %s1791_s14 }
 0x34d   :  { %v3373_v35 = vpop.permute.xlu1 %1657 }
 0x34e   :  { %1665 = vrot.lane.b32.xlu1 %v1478_v19, %s1791_s14 }
 0x37a   :  { %v1486_v15 = vpop.permute.xlu0 %1485 }
 0x37b   :  { %v1496_v23 = vsel %vm97_vm7, %v3320_v9, %v1486_v15 }
 0x37c   :  { %v1488_v45 = vpop.permute.xlu1 %1487 }
 0x37d   :  { %v1495_v36 = vsel %vm97_vm7, %v1486_v15, %v1488_v45 }
 0x37f   :  { %v1510_v37 = vpop.permute.xlu0 %1509 }
 0x380   :  { %v1520_v21 = vsel %vm134_vm6, %v3326_v4, %v1510_v37 }
 0x381   :  { %v1512_v50 = vpop.permute.xlu1 %1511  ;;  %v1525_v7 = vadd.f32 %v1520_v21, %v1496_v23 }
 0x382   :  { %v1519_v3 = vsel %vm134_vm6, %v1510_v37, %v1512_v50 }
 0x383   :  { %v1526_v11 = vadd.f32 %v1519_v3, %v1495_v36 }
 0x384   :  { %v1534_v62 = vpop.permute.xlu0 %1533 }
 0x385   :  { %v1544_v29 = vsel %vm171_vm5, %v3332_v12, %v1534_v62 }
 0x386   :  { %v1536_v48 = vpop.permute.xlu1 %1535  ;;  %v1549_v6 = vadd.f32 %v1544_v29, %v1525_v7 }
 0x387   :  { %v1543_v4 = vsel %vm171_vm5, %v1534_v62, %v1536_v48 }
 0x388   :  { %v1550_v15 = vadd.f32 %v1543_v4, %v1526_v11 }
 0x389   :  { %v1558_v59 = vpop.permute.xlu0 %1557 }
 0x38a   :  { %v1568_v9 = vsel %vm208_vm4, %v3338_v10, %v1558_v59 }
 0x38b   :  { %v1560_v54 = vpop.permute.xlu1 %1559 }
 0x38c   :  { %v1567_v37 = vsel %vm208_vm4, %v1558_v59, %v1560_v54 }
 0x392   :  { %v1588_v56 = vpop.permute.xlu0 %1587 }
 0x393   :  { %v1598_v17 = vsel %vm245_vm3, %v3361_v5, %v1588_v56 }
 0x394   :  { %v3391_v58 = vadd.f32 %v1598_v17, %v1578_v41  ;;  %v3393_v14 = vpop.permute.xlu1 %1589  ;;  %v1574_v41 = vadd.f32 %v1567_v37, %v1550_v15 }
 0x396   :  { %v1612_v24 = vpop.permute.xlu0 %1611 }
 0x398   :  { %v3395_v20 = vpop.permute.xlu1 %1613 }
 0x399   :  { %v1621_v21 = vsel %vm282_vm2, %v1612_v24, %v3395_v20 }
 0x39a   :  { %v1490_v46 = vpop.permute.xlu0 %1489 }
 0x39c   :  { %v1492_v42 = vpop.permute.xlu1 %1491 }
 0x39d   :  { %v1498_v51 = vsel %vm97_vm7, %v1492_v42, %v3317_v28  ;;  %v1494_v28 = vsel %vm97_vm7, %v1488_v45, %v1490_v46 }
 0x39e   :  { %v3397_v2 = vpop.permute.xlu0 %1635 }
 0x3a0   :  { %v3399_v38 = vpop.permute.xlu1 %1637 }
 0x3a2   :  { %v1514_v33 = vpop.permute.xlu0 %1513 }
 0x3a3   :  { %v1518_v61 = vsel %vm134_vm6, %v1512_v50, %v1514_v33  ;;  %v1493_v50 = vsel %vm97_vm7, %v1490_v46, %v1492_v42 }
 0x3a4   :  { %v1516_v8 = vpop.permute.xlu1 %1515 }
 0x3a5   :  { %v1522_v16 = vsel %vm134_vm6, %v1516_v8, %v3323_v1  ;;  %v1517_v19 = vsel %vm134_vm6, %v1514_v33, %v1516_v8  ;;  %v1573_v1 = vadd.f32 %v1568_v9, %v1549_v6 }
 0x3a6   :  { %v1538_v27 = vpop.permute.xlu0 %1537  ;;  %v1523_v60 = vadd.f32 %v1522_v16, %v1498_v51  ;;  %v1528_v62 = vadd.f32 %v1517_v19, %v1493_v50  ;;  %v1645_v16 = vsel %vm319_vm1, %v3397_v2, %v3399_v38 }
 0x3a7   :  { %v1542_v55 = vsel %vm171_vm5, %v1536_v48, %v1538_v27  ;;  %v1597_v48 = vsel %vm245_vm3, %v1588_v56, %v3393_v14  ;;  %v1599_v56 = vsel %vm245_vm3, %v3359_v52, %v3361_v5  ;;  %v1646_v5 = vsel %vm319_vm1, %v3369_v25, %v3397_v2 }
 0x3a8   :  { %v1540_v47 = vpop.permute.xlu1 %1539 }
 0x3a9   :  { %v1546_v10 = vsel %vm171_vm5, %v1540_v47, %v3329_v0  ;;  %v1541_v22 = vsel %vm171_vm5, %v1538_v27, %v1540_v47  ;;  %v1527_v0 = vadd.f32 %v1518_v61, %v1494_v28  ;;  %v1579_v27 = vadd.f32 %v1573_v1, %v3307_v53 }
 0x3aa   :  { %v3412_v39 = vpop.permute.xlu0 %1615  ;;  %v1547_v32 = vadd.f32 %v1546_v10, %v1523_v60  ;;  %v1552_v42 = vadd.f32 %v1541_v22, %v1528_v62  ;;  %v1623_v53 = vsel %vm282_vm2, %v3363_v43, %v3365_v31 }
 0x3ab   :  { %v1551_v46 = vadd.f32 %v1542_v55, %v1527_v0  ;;  %v1603_v29 = vadd.f32 %v1597_v48, %v1579_v27 }
 0x3ac   :  { %v3424_v12 = vpop.permute.xlu1 %1617 }
 0x3ad   :  { %v1627_v9 = vadd.f32 %v1621_v21, %v1603_v29  ;;  %v1619_v60 = vsel %vm282_vm2, %v3412_v39, %v3424_v12 }
 0x3ae   :  { %v1562_v13 = vpop.permute.xlu0 %1561 }
 0x3af   :  { %v1566_v59 = vsel %vm208_vm4, %v1560_v54, %v1562_v13  ;;  %v1622_v54 = vsel %vm282_vm2, %v3365_v31, %v1612_v24  ;;  %v1647_v24 = vsel %vm319_vm1, %v3367_v34, %v3369_v25  ;;  %v1580_v31 = vadd.f32 %v1574_v41, %v3309_v49 }
 0x3b0   :  { %v1564_v40 = vpop.permute.xlu1 %1563  ;;  %v1575_v47 = vadd.f32 %v1566_v59, %v1551_v46  ;;  %v1626_v4 = vadd.f32 %v1622_v54, %v3391_v58  ;;  %v1620_v58 = vsel %vm282_vm2, %v3395_v20, %v3412_v39  ;;  %v1624_v20 = vsel %vm282_vm2, %v3424_v12, %v3363_v43 }
 0x3b1   :  { %v1565_v45 = vsel %vm208_vm4, %v1562_v13, %v1564_v40  ;;  %v1570_v17 = vsel %vm208_vm4, %v1564_v40, %v3335_v30 }
 0x3b2   :  { %v1571_v33 = vadd.f32 %v1570_v17, %v1547_v32  ;;  %v1640_v8 = vpop.permute.xlu0 %1639  ;;  %v1576_v30 = vadd.f32 %v1565_v45, %v1552_v42  ;;  %v1581_v25 = vadd.f32 %v1575_v47, %v3340_v18  ;;  %v1650_v49 = vadd.f32 %v1646_v5, %v1626_v4 }
 0x3b3   :  { %v1644_v0 = vsel %vm319_vm1, %v3399_v38, %v1640_v8 }
 0x3b4   :  { %v1577_v23 = vadd.f32 %v1571_v33, %v3287_v44  ;;  %v1642_v3 = vpop.permute.xlu1 %1641  ;;  %v1671_v44 = vsel %vm356_vm8, %v3371_v57, %v3373_v35  ;;  %v1582_v61 = vadd.f32 %v1576_v30, %v3348_v63  ;;  %v1651_v63 = vadd.f32 %v1645_v16, %v1627_v9 }
 0x3b5   :  { %v1648_v41 = vsel %vm319_vm1, %v1642_v3, %v3367_v34 }
 0x3b6   :  { %v1601_v7 = vadd.f32 %v1599_v56, %v1577_v23  ;;  %v1592_v36 = vpop.permute.xlu0 %1591 }
 0x3b7   :  { %v1596_v11 = vsel %vm245_vm3, %v3393_v14, %v1592_v36 }
 0x3b8   :  { %v1625_v6 = vadd.f32 %v1623_v53, %v1601_v7  ;;  %v1604_v51 = vadd.f32 %v1596_v11, %v1580_v31  ;;  %v1594_v19 = vpop.permute.xlu1 %1593 }
 0x3b9   :  { %v1595_v2 = vsel %vm245_vm3, %v1592_v36, %v1594_v19  ;;  %v1600_v14 = vsel %vm245_vm3, %v1594_v19, %v3359_v52 }
 0x3ba   :  { %v1649_v10 = vadd.f32 %v1647_v24, %v1625_v6  ;;  %v1628_v15 = vadd.f32 %v1620_v58, %v1604_v51  ;;  %v1605_v1 = vadd.f32 %v1595_v2, %v1581_v25  ;;  %v1606_v18 = vadd.f32 %v1600_v14, %v1582_v61  ;;  %v1660_v37 = vpop.permute.xlu0 %1659 }
 0x3bb   :  { %v1670_v52 = vsel %vm356_vm8, %v3373_v35, %v1660_v37  ;;  %v1643_v35 = vsel %vm319_vm1, %v1640_v8, %v1642_v3 }
 0x3bc   :  { %v1673_v13 = vadd.f32 %v1671_v44, %v1649_v10  ;;  %v1629_v28 = vadd.f32 %v1619_v60, %v1605_v1  ;;  %v1630_v50 = vadd.f32 %v1624_v20, %v1606_v18  ;;  %v1674_v55 = vadd.f32 %v1670_v52, %v1650_v49  ;;  %v1662_v22 = vpop.permute.xlu1 %1661 }
 0x3bd   :  { %v1669_v39 = vsel %vm356_vm8, %v1660_v37, %v1662_v22  ;;  %v1652_v12 = vadd.f32 %v1644_v0, %v1628_v15 }
 0x3be   :  { %v1679_v62 = vmax.f32 %v1673_v13, 0.0  ;;  %v1680_v32 = vmax.f32 %v1674_v55, 0.0  ;;  %v1675_v40 = vadd.f32 %v1669_v39, %v1651_v63  ;;  %v1664_v43 = vpop.permute.xlu0 %1663  ;;  %v1653_v17 = vadd.f32 %v1643_v35, %v1629_v28 }
 0x3bf   :  { %v1668_v59 = vsel %vm356_vm8, %v1662_v22, %v1664_v43  ;;  %v1654_v48 = vadd.f32 %v1648_v41, %v1630_v50 }
 0x3c0   :  { %1685 = vst [vmem:[%s3554_s4] sm:$0xff] %v1679_v62  ;;  %1686 = vst [vmem:[%s3554_s4 + $0x8] sm:$0xff] %v1680_v32  ;;  %v1681_v38 = vmax.f32 %v1675_v40, 0.0  ;;  %v1676_v45 = vadd.f32 %v1668_v59, %v1652_v12  ;;  %v1666_v46 = vpop.permute.xlu1 %1665 }
 0x3c1   :  { %v1667_v42 = vsel %vm356_vm8, %v1664_v43, %v1666_v46  ;;  %v1672_v34 = vsel %vm356_vm8, %v1666_v46, %v3371_v57 }
 0x3c2   :  { %1687 = vst [vmem:[%s3554_s4 + $0x10] sm:$0xff] %v1681_v38  ;;  %v1682_v33 = vmax.f32 %v1676_v45, 0.0  ;;  %v1677_v8 = vadd.f32 %v1667_v42, %v1653_v17  ;;  %v1678_v27 = vadd.f32 %v1672_v34, %v1654_v48 }
 0x3c4   :  { %1688 = vst [vmem:[%s3554_s4 + $0x18] sm:$0xff] %v1682_v33  ;;  %v1683_v54 = vmax.f32 %v1677_v8, 0.0  ;;  %v1684_v21 = vmax.f32 %v1678_v27, 0.0 }
 0x3c6   :  { %1689 = vst [vmem:[%s3554_s4 + $0x20] sm:$0xff] %v1683_v54  ;;  %1690 = vst [vmem:[%s3554_s4 + $0x28] sm:$0xff] %v1684_v21 }

</bundles_post_ra>
